<compile_context>
chip_gen: v7x
topology: tpu7x:2x2x1
jax: 0.10.0
libtpu: 0.0.40
codegen_flags: <defaults>
</compile_context>

<pallas_src>
import math

import jax
import jax.numpy as jnp
from jax import lax
from jax.experimental import pallas as pl
from jax.experimental.pallas import tpu as pltpu

BF16 = jnp.bfloat16


# ------------------------------ Fused kernel ---------------------------------
def make_fused_kernel(bt, T, D, qkv, H, num_layers, out_dim):
    def kernel(*refs):
        (x_ref, wqkv_ref, bqkv_ref, wa_ref, ba_ref) = refs[:5]
        lstm_refs = refs[5:5 + 3 * num_layers]
        wfc_ref = refs[5 + 3 * num_layers]
        bfc_ref = refs[6 + 3 * num_layers]
        out_ref = refs[7 + 3 * num_layers]

        # ---------------- attention over the whole batch tile ----------------
        x3 = x_ref[...]                              # (bt, T, D) f32
        x2 = x3.reshape(bt * T, D)
        xb = x2.astype(BF16)

        # Fused Q/K/V projection: one (bt*T, D) x (D, 3*qkv) MXU matmul.
        # 1/sqrt(qkv) is pre-folded into the Q slice of wqkv/bqkv.
        qkv2 = (jnp.dot(xb, wqkv_ref[...], preferred_element_type=jnp.float32)
                + bqkv_ref[...])                     # (bt*T, 3*qkv) f32
        qkv3 = qkv2.reshape(bt, T, 3 * qkv)
        q = qkv3[:, :, 0 * qkv:1 * qkv].astype(BF16)
        k = qkv3[:, :, 1 * qkv:2 * qkv].astype(BF16)
        v = qkv3[:, :, 2 * qkv:3 * qkv].astype(BF16)

        # Batched QK^T contracting the last dim of both (no K transpose).
        s = jnp.einsum('btq,bsq->bts', q, k,
                       preferred_element_type=jnp.float32)       # (bt, T, T)
        s = s - jnp.max(s, axis=-1, keepdims=True)
        p = jnp.exp(s)
        p = p * pl.reciprocal(jnp.sum(p, axis=-1, keepdims=True), approx=True)
        ctx = jnp.einsum('bts,bsq->btq', p.astype(BF16), v,
                         preferred_element_type=jnp.float32)     # (bt, T, qkv)

        layer_in2 = (jnp.dot(ctx.reshape(bt * T, qkv).astype(BF16), wa_ref[...],
                             preferred_element_type=jnp.float32)
                     + ba_ref[...] + x2)                         # (bt*T, D)

        # ---------------- stacked LSTM (PyTorch gate order: i, f, g, o) ------
        h = jnp.zeros((bt, H), jnp.float32)
        for l in range(num_layers):
            wih = lstm_refs[3 * l + 0][...]          # (Din, 4H) bf16
            whh = lstm_refs[3 * l + 1][...]          # (H,   4H) bf16
            b = lstm_refs[3 * l + 2][...]            # (1,   4H) f32 (b_ih + b_hh)

            # Input contribution for all (b, t) rows, hoisted out of the recurrence.
            xg3 = (jnp.dot(layer_in2.astype(BF16), wih,
                           preferred_element_type=jnp.float32) + b
                   ).reshape(bt, T, 4 * H)

            h = jnp.zeros((bt, H), jnp.float32)
            c = jnp.zeros((bt, H), jnp.float32)
            last = (l == num_layers - 1)
            hs = []
            for t in range(T):                       # static unroll (T small)
                gates = xg3[:, t, :] + jnp.dot(h.astype(BF16), whh,
                                               preferred_element_type=jnp.float32)
                # Full-row activations (one sigmoid + one tanh over 4H lanes),
                # then lane slices — fewer EUP passes than 4 narrow activations.
                sg = jax.nn.sigmoid(gates)
                tg = jnp.tanh(gates)
                i_g = sg[:, 0 * H:1 * H]
                f_g = sg[:, 1 * H:2 * H]
                g_g = tg[:, 2 * H:3 * H]
                o_g = sg[:, 3 * H:4 * H]
                c = f_g * c + i_g * g_g
                h = o_g * jnp.tanh(c)
                if not last:
                    hs.append(h)                     # keep sequence in vregs
            if not last:
                layer_in2 = jnp.stack(hs, axis=1).reshape(bt * T, H)

        # ---------------- final FC on h_T of the last layer (one slab write) --
        out_ref[...] = (jnp.dot(h.astype(BF16), wfc_ref[...],
                                preferred_element_type=jnp.float32) + bfc_ref[...])

    return kernel


# --------------------------- Host-side weight prep ----------------------------
def prepare_params(params, *, qkv, hidden_size, num_layers):
    """One-time prep: transpose to (in,out), cast to bf16, fuse QKV, fold scale."""
    H = hidden_size
    inv_scale = 1.0 / math.sqrt(qkv)

    def t_bf16(w):                     # nn.Linear layout (out,in) -> (in,out), bf16
        return jnp.asarray(w).T.astype(BF16)

    wqkv = jnp.concatenate(
        [jnp.asarray(params["wq"]) * inv_scale,       # fold 1/sqrt(qkv) into Q
         jnp.asarray(params["wk"]),
         jnp.asarray(params["wv"])], axis=0).T.astype(BF16)       # (D, 3*qkv)
    bqkv = jnp.concatenate(
        [jnp.asarray(params["bq"]).reshape(1, -1) * inv_scale,
         jnp.asarray(params["bk"]).reshape(1, -1),
         jnp.asarray(params["bv"]).reshape(1, -1)], axis=1)       # (1, 3*qkv) f32

    args = [wqkv, bqkv,
            t_bf16(params["wa"]),
            jnp.asarray(params["ba"]).reshape(1, -1)]
    for l in range(num_layers):
        args.append(t_bf16(params[f"w_ih_l{l}"]))                 # (Din, 4H)
        args.append(t_bf16(params[f"w_hh_l{l}"]))                 # (H,   4H)
        args.append((params[f"b_ih_l{l}"] + params[f"b_hh_l{l}"]).reshape(1, 4 * H))
    args.append(t_bf16(params["w_fc"]))                           # (H, out)
    args.append(jnp.asarray(params["b_fc"]).reshape(1, -1))       # (1, out)
    return args


# ------------------------------- Full forward ---------------------------------
def attentional_lstm_forward(x, prepared, *, qkv, hidden_size, num_layers,
                             batch_tile=None):
    B, T, D = x.shape
    H = hidden_size
    out_dim = prepared[-1].shape[-1]
    bt = B if batch_tile is None else batch_tile
    assert B % bt == 0

    in_specs = [pl.BlockSpec((bt, T, D), lambda i: (i, 0, 0))]
    for a in prepared:                 # whole weight, same block every grid step
        nd = a.ndim
        in_specs.append(pl.BlockSpec(a.shape, lambda i, _nd=nd: (0,) * _nd))

    kernel = make_fused_kernel(bt, T, D, qkv, H, num_layers, out_dim)
    return pl.pallas_call(
        kernel,
        out_shape=jax.ShapeDtypeStruct((B, out_dim), jnp.float32),
        grid=(B // bt,),               # collapses to (1,) by default: whole batch in-kernel
        in_specs=in_specs,
        out_specs=pl.BlockSpec((bt, out_dim), lambda i: (i, 0)),
        compiler_params=pltpu.CompilerParams(
            dimension_semantics=("parallel",)),
    )(x, *prepared)


# ------------------------------ Params / reference ----------------------------
def init_params(key, input_size, qkv, hidden_size, num_layers, output_size):
    def uniform(k, shape, bound):
        return jax.random.uniform(k, shape, jnp.float32, -bound, bound)

    keys = iter(jax.random.split(key, 4 * 2 + 4 * num_layers + 2))
    p = {}
    bi = 1.0 / math.sqrt(input_size)
    p["wq"] = uniform(next(keys), (qkv, input_size), bi)
    p["bq"] = uniform(next(keys), (1, qkv), bi)
    p["wk"] = uniform(next(keys), (qkv, input_size), bi)
    p["bk"] = uniform(next(keys), (1, qkv), bi)
    p["wv"] = uniform(next(keys), (qkv, input_size), bi)
    p["bv"] = uniform(next(keys), (1, qkv), bi)
    bq_ = 1.0 / math.sqrt(qkv)
    p["wa"] = uniform(next(keys), (input_size, qkv), bq_)
    p["ba"] = uniform(next(keys), (1, input_size), bq_)
    bh = 1.0 / math.sqrt(hidden_size)
    for l in range(num_layers):
        din = input_size if l == 0 else hidden_size
        p[f"w_ih_l{l}"] = uniform(next(keys), (4 * hidden_size, din), bh)
        p[f"w_hh_l{l}"] = uniform(next(keys), (4 * hidden_size, hidden_size), bh)
        p[f"b_ih_l{l}"] = uniform(next(keys), (4 * hidden_size,), bh)
        p[f"b_hh_l{l}"] = uniform(next(keys), (4 * hidden_size,), bh)
    p["w_fc"] = uniform(next(keys), (output_size, hidden_size), bh)
    p["b_fc"] = uniform(next(keys), (1, output_size), bh)
    return p


def reference_forward(x, params, *, qkv, hidden_size, num_layers):
    def linear(v, w, b):
        return jnp.einsum('...i,oi->...o', v, w) + b.reshape(-1)

    Q = linear(x, params["wq"], params["bq"])
    K = linear(x, params["wk"], params["bk"])
    V = linear(x, params["wv"], params["bv"])
    s = jnp.einsum('btq,bsq->bts', Q, K) / math.sqrt(qkv)
    scores = jax.nn.softmax(s, axis=-1)
    scaled = jnp.einsum('bts,bsq->btq', scores, V)
    h_in = linear(scaled, params["wa"], params["ba"]) + x

    B = x.shape[0]
    H = hidden_size
    for l in range(num_layers):
        wih, whh = params[f"w_ih_l{l}"], params[f"w_hh_l{l}"]
        b = params[f"b_ih_l{l}"] + params[f"b_hh_l{l}"]

        def step(carry, x_t):
            h, c = carry
            gates = x_t @ wih.T + h @ whh.T + b
            i, f, g, o = jnp.split(gates, 4, axis=-1)
            c = jax.nn.sigmoid(f) * c + jax.nn.sigmoid(i) * jnp.tanh(g)
            h = jax.nn.sigmoid(o) * jnp.tanh(c)
            return (h, c), h

        init = (jnp.zeros((B, H), jnp.float32), jnp.zeros((B, H), jnp.float32))
        _, hs = lax.scan(step, init, jnp.transpose(h_in, (1, 0, 2)))
        h_in = jnp.transpose(hs, (1, 0, 2))

    return linear(h_in[:, -1, :], params["w_fc"], params["b_fc"])


if __name__ == "__main__":
    B, T = 2, 8
    input_size, qkv, hidden_size, num_layers, output_size = 16, 16, 32, 2, 4

    key = jax.random.PRNGKey(0)
    k_x, k_p = jax.random.split(key)
    x = jax.random.normal(k_x, (B, T, input_size), jnp.float32)
    params = init_params(k_p, input_size, qkv, hidden_size, num_layers, output_size)

    prepared = prepare_params(params, qkv=qkv, hidden_size=hidden_size,
                              num_layers=num_layers)
    prepared = [jax.block_until_ready(a) for a in prepared]   # one-time, hoisted

    out = attentional_lstm_forward(x, prepared, qkv=qkv, hidden_size=hidden_size,
                                   num_layers=num_layers)
    out = jax.block_until_ready(out)

    ref = jax.block_until_ready(
        reference_forward(x, params, qkv=qkv, hidden_size=hidden_size,
                          num_layers=num_layers))

    assert out.shape == (B, output_size), out.shape
    # bf16 MXU inputs with f32 accumulation + approx reciprocal -> loose tolerance.
    assert jnp.allclose(out, ref, rtol=2e-2, atol=1e-2), (out, ref)
    print("KERNEL_OK")
</pallas_src>

<mosaic_0001>
module attributes {stable_mosaic.version = 11 : i64} {
  func.func @kernel(%arg0: i32, %arg1: memref<2x8x16xf32, #tpu.memory_space<vmem>>, %arg2: memref<16x48xbf16, #tpu.memory_space<vmem>>, %arg3: memref<1x48xf32, #tpu.memory_space<vmem>>, %arg4: memref<16x16xbf16, #tpu.memory_space<vmem>>, %arg5: memref<1x16xf32, #tpu.memory_space<vmem>>, %arg6: memref<16x128xbf16, #tpu.memory_space<vmem>>, %arg7: memref<32x128xbf16, #tpu.memory_space<vmem>>, %arg8: memref<1x128xf32, #tpu.memory_space<vmem>>, %arg9: memref<32x128xbf16, #tpu.memory_space<vmem>>, %arg10: memref<32x128xbf16, #tpu.memory_space<vmem>>, %arg11: memref<1x128xf32, #tpu.memory_space<vmem>>, %arg12: memref<32x4xbf16, #tpu.memory_space<vmem>>, %arg13: memref<1x4xf32, #tpu.memory_space<vmem>>, %arg14: memref<2x4xf32, #tpu.memory_space<vmem>>) attributes {dimension_semantics = [#tpu.dimension_semantics<parallel>], iteration_bounds = array<i64: 1>, scalar_prefetch = 0 : i64, scratch_operands = 0 : i64, tpu.core_type = #tpu.core_type<tc>, window_params = [{transform_indices = @transform_0, window_bounds = array<i64: 2, 8, 16>}, {pipeline_mode = #tpu.pipeline_mode<synchronous>, transform_indices = @transform_1, window_bounds = array<i64: 16, 48>}, {pipeline_mode = #tpu.pipeline_mode<synchronous>, transform_indices = @transform_2, window_bounds = array<i64: 1, 48>}, {pipeline_mode = #tpu.pipeline_mode<synchronous>, transform_indices = @transform_3, window_bounds = array<i64: 16, 16>}, {pipeline_mode = #tpu.pipeline_mode<synchronous>, transform_indices = @transform_4, window_bounds = array<i64: 1, 16>}, {pipeline_mode = #tpu.pipeline_mode<synchronous>, transform_indices = @transform_5, window_bounds = array<i64: 16, 128>}, {pipeline_mode = #tpu.pipeline_mode<synchronous>, transform_indices = @transform_6, window_bounds = array<i64: 32, 128>}, {pipeline_mode = #tpu.pipeline_mode<synchronous>, transform_indices = @transform_7, window_bounds = array<i64: 1, 128>}, {pipeline_mode = #tpu.pipeline_mode<synchronous>, transform_indices = @transform_8, window_bounds = array<i64: 32, 128>}, {pipeline_mode = #tpu.pipeline_mode<synchronous>, transform_indices = @transform_9, window_bounds = array<i64: 32, 128>}, {pipeline_mode = #tpu.pipeline_mode<synchronous>, transform_indices = @transform_10, window_bounds = array<i64: 1, 128>}, {pipeline_mode = #tpu.pipeline_mode<synchronous>, transform_indices = @transform_11, window_bounds = array<i64: 32, 4>}, {pipeline_mode = #tpu.pipeline_mode<synchronous>, transform_indices = @transform_12, window_bounds = array<i64: 1, 4>}, {transform_indices = @transform_13, window_bounds = array<i64: 2, 4>}]} {
    %c0 = arith.constant 0 : index
    %c0_0 = arith.constant 0 : index
    %c0_1 = arith.constant 0 : index
    %0 = vector.load %arg1[%c0, %c0_0, %c0_1] : memref<2x8x16xf32, #tpu.memory_space<vmem>>, vector<2x8x16xf32>
    %1 = vector.shape_cast %0 : vector<2x8x16xf32> to vector<16x16xf32>
    %2 = arith.truncf %1 : vector<16x16xf32> to vector<16x16xbf16>
    %c0_2 = arith.constant 0 : index
    %c0_3 = arith.constant 0 : index
    %3 = vector.load %arg2[%c0_2, %c0_3] : memref<16x48xbf16, #tpu.memory_space<vmem>>, vector<16x48xbf16>
    %cst = arith.constant dense<0.000000e+00> : vector<16x48xf32>
    %4 = tpu.matmul %2, %3, %cst {dimension_numbers = #tpu.dot_dimension_numbers<[1], [0], [0], [1], [0, 0, 1, 1], [], []>} : vector<16x16xbf16>, vector<16x48xbf16>, vector<16x48xf32> -> vector<16x48xf32>
    %c0_4 = arith.constant 0 : index
    %c0_5 = arith.constant 0 : index
    %5 = vector.load %arg3[%c0_4, %c0_5] : memref<1x48xf32, #tpu.memory_space<vmem>>, vector<1x48xf32>
    %6 = vector.broadcast %5 : vector<1x48xf32> to vector<16x48xf32>
    %7 = arith.addf %4, %6 : vector<16x48xf32>
    %8 = vector.shape_cast %7 : vector<16x48xf32> to vector<2x8x48xf32>
    %9 = vector.extract_strided_slice %8 {offsets = [0, 0, 0], sizes = [2, 8, 16], strides = [1, 1, 1]} : vector<2x8x48xf32> to vector<2x8x16xf32>
    %10 = arith.truncf %9 : vector<2x8x16xf32> to vector<2x8x16xbf16>
    %11 = vector.extract_strided_slice %8 {offsets = [0, 0, 16], sizes = [2, 8, 16], strides = [1, 1, 1]} : vector<2x8x48xf32> to vector<2x8x16xf32>
    %12 = arith.truncf %11 : vector<2x8x16xf32> to vector<2x8x16xbf16>
    %13 = vector.extract_strided_slice %8 {offsets = [0, 0, 32], sizes = [2, 8, 16], strides = [1, 1, 1]} : vector<2x8x48xf32> to vector<2x8x16xf32>
    %14 = arith.truncf %13 : vector<2x8x16xf32> to vector<2x8x16xbf16>
    "tpu.trace_start"() <{level = 10 : i32, message = "btq,bsq->bts"}> : () -> ()
    %cst_6 = arith.constant dense<0.000000e+00> : vector<2x8x8xf32>
    %15 = tpu.matmul %10, %12, %cst_6 {dimension_numbers = #tpu.dot_dimension_numbers<[2], [2], [1], [1], [0, 0, 0, 1, 1, 1], [0], [0]>} : vector<2x8x16xbf16>, vector<2x8x16xbf16>, vector<2x8x8xf32> -> vector<2x8x8xf32>
    "tpu.trace_stop"() : () -> ()
    %cst_7 = arith.constant dense<0xFF800000> : vector<2x8xf32>
    %16 = vector.multi_reduction <maximumf>, %15, %cst_7 [2] : vector<2x8x8xf32> to vector<2x8xf32>
    %17 = vector.shape_cast %16 : vector<2x8xf32> to vector<2x8x1xf32>
    %18 = vector.broadcast %17 : vector<2x8x1xf32> to vector<2x8x8xf32>
    %19 = arith.subf %15, %18 : vector<2x8x8xf32>
    %20 = math.exp %19 : vector<2x8x8xf32>
    %cst_8 = arith.constant dense<0.000000e+00> : vector<2x8xf32>
    %21 = vector.multi_reduction <add>, %20, %cst_8 [2] : vector<2x8x8xf32> to vector<2x8xf32>
    %22 = vector.shape_cast %21 : vector<2x8xf32> to vector<2x8x1xf32>
    %23 = tpu.reciprocal %22 {approx = true} : vector<2x8x1xf32> -> vector<2x8x1xf32>
    %24 = vector.broadcast %23 : vector<2x8x1xf32> to vector<2x8x8xf32>
    %25 = arith.mulf %20, %24 : vector<2x8x8xf32>
    %26 = arith.truncf %25 : vector<2x8x8xf32> to vector<2x8x8xbf16>
    "tpu.trace_start"() <{level = 10 : i32, message = "bts,bsq->btq"}> : () -> ()
    %cst_9 = arith.constant dense<0.000000e+00> : vector<2x8x16xf32>
    %27 = tpu.matmul %26, %14, %cst_9 {dimension_numbers = #tpu.dot_dimension_numbers<[2], [1], [1], [2], [0, 0, 0, 1, 1, 2], [0], [0]>} : vector<2x8x8xbf16>, vector<2x8x16xbf16>, vector<2x8x16xf32> -> vector<2x8x16xf32>
    "tpu.trace_stop"() : () -> ()
    %28 = vector.shape_cast %27 : vector<2x8x16xf32> to vector<16x16xf32>
    %29 = arith.truncf %28 : vector<16x16xf32> to vector<16x16xbf16>
    %c0_10 = arith.constant 0 : index
    %c0_11 = arith.constant 0 : index
    %30 = vector.load %arg4[%c0_10, %c0_11] : memref<16x16xbf16, #tpu.memory_space<vmem>>, vector<16x16xbf16>
    %cst_12 = arith.constant dense<0.000000e+00> : vector<16x16xf32>
    %31 = tpu.matmul %29, %30, %cst_12 {dimension_numbers = #tpu.dot_dimension_numbers<[1], [0], [0], [1], [0, 0, 1, 1], [], []>} : vector<16x16xbf16>, vector<16x16xbf16>, vector<16x16xf32> -> vector<16x16xf32>
    %c0_13 = arith.constant 0 : index
    %c0_14 = arith.constant 0 : index
    %32 = vector.load %arg5[%c0_13, %c0_14] : memref<1x16xf32, #tpu.memory_space<vmem>>, vector<1x16xf32>
    %33 = vector.broadcast %32 : vector<1x16xf32> to vector<16x16xf32>
    %34 = arith.addf %31, %33 : vector<16x16xf32>
    %35 = arith.addf %34, %1 : vector<16x16xf32>
    %c0_15 = arith.constant 0 : index
    %c0_16 = arith.constant 0 : index
    %36 = vector.load %arg6[%c0_15, %c0_16] : memref<16x128xbf16, #tpu.memory_space<vmem>>, vector<16x128xbf16>
    %c0_17 = arith.constant 0 : index
    %c0_18 = arith.constant 0 : index
    %37 = vector.load %arg7[%c0_17, %c0_18] : memref<32x128xbf16, #tpu.memory_space<vmem>>, vector<32x128xbf16>
    %c0_19 = arith.constant 0 : index
    %c0_20 = arith.constant 0 : index
    %38 = vector.load %arg8[%c0_19, %c0_20] : memref<1x128xf32, #tpu.memory_space<vmem>>, vector<1x128xf32>
    %39 = arith.truncf %35 : vector<16x16xf32> to vector<16x16xbf16>
    %cst_21 = arith.constant dense<0.000000e+00> : vector<16x128xf32>
    %40 = tpu.matmul %39, %36, %cst_21 {dimension_numbers = #tpu.dot_dimension_numbers<[1], [0], [0], [1], [0, 0, 1, 1], [], []>} : vector<16x16xbf16>, vector<16x128xbf16>, vector<16x128xf32> -> vector<16x128xf32>
    %41 = vector.broadcast %38 : vector<1x128xf32> to vector<16x128xf32>
    %42 = arith.addf %40, %41 : vector<16x128xf32>
    %43 = vector.shape_cast %42 : vector<16x128xf32> to vector<2x8x128xf32>
    %cst_22 = arith.constant 0.000000e+00 : f32
    %44 = vector.broadcast %cst_22 : f32 to vector<2x32xf32>
    %cst_23 = arith.constant 0.000000e+00 : f32
    %45 = vector.broadcast %cst_23 : f32 to vector<2x32xf32>
    %46 = vector.extract_strided_slice %43 {offsets = [0, 0, 0], sizes = [2, 1, 128], strides = [1, 1, 1]} : vector<2x8x128xf32> to vector<2x1x128xf32>
    %47 = vector.shape_cast %46 : vector<2x1x128xf32> to vector<2x128xf32>
    %48 = arith.truncf %44 : vector<2x32xf32> to vector<2x32xbf16>
    %cst_24 = arith.constant dense<0.000000e+00> : vector<2x128xf32>
    %49 = tpu.matmul %48, %37, %cst_24 {dimension_numbers = #tpu.dot_dimension_numbers<[1], [0], [0], [1], [0, 0, 1, 1], [], []>} : vector<2x32xbf16>, vector<32x128xbf16>, vector<2x128xf32> -> vector<2x128xf32>
    %50 = arith.addf %47, %49 : vector<2x128xf32>
    %51 = arith.negf %50 : vector<2x128xf32>
    %52 = math.exp %51 : vector<2x128xf32>
    %cst_25 = arith.constant 1.000000e+00 : f32
    %53 = vector.broadcast %cst_25 : f32 to vector<2x128xf32>
    %54 = arith.addf %53, %52 : vector<2x128xf32>
    %55 = arith.divf %53, %54 : vector<2x128xf32>
    %56 = math.tanh %50 : vector<2x128xf32>
    %57 = vector.extract_strided_slice %55 {offsets = [0, 0], sizes = [2, 32], strides = [1, 1]} : vector<2x128xf32> to vector<2x32xf32>
    %58 = vector.extract_strided_slice %55 {offsets = [0, 32], sizes = [2, 32], strides = [1, 1]} : vector<2x128xf32> to vector<2x32xf32>
    %59 = vector.extract_strided_slice %56 {offsets = [0, 64], sizes = [2, 32], strides = [1, 1]} : vector<2x128xf32> to vector<2x32xf32>
    %60 = vector.extract_strided_slice %55 {offsets = [0, 96], sizes = [2, 32], strides = [1, 1]} : vector<2x128xf32> to vector<2x32xf32>
    %61 = arith.mulf %58, %45 : vector<2x32xf32>
    %62 = arith.mulf %57, %59 : vector<2x32xf32>
    %63 = arith.addf %61, %62 : vector<2x32xf32>
    %64 = math.tanh %63 : vector<2x32xf32>
    %65 = arith.mulf %60, %64 : vector<2x32xf32>
    %66 = vector.extract_strided_slice %43 {offsets = [0, 1, 0], sizes = [2, 1, 128], strides = [1, 1, 1]} : vector<2x8x128xf32> to vector<2x1x128xf32>
    %67 = vector.shape_cast %66 : vector<2x1x128xf32> to vector<2x128xf32>
    %68 = arith.truncf %65 : vector<2x32xf32> to vector<2x32xbf16>
    %cst_26 = arith.constant dense<0.000000e+00> : vector<2x128xf32>
    %69 = tpu.matmul %68, %37, %cst_26 {dimension_numbers = #tpu.dot_dimension_numbers<[1], [0], [0], [1], [0, 0, 1, 1], [], []>} : vector<2x32xbf16>, vector<32x128xbf16>, vector<2x128xf32> -> vector<2x128xf32>
    %70 = arith.addf %67, %69 : vector<2x128xf32>
    %71 = arith.negf %70 : vector<2x128xf32>
    %72 = math.exp %71 : vector<2x128xf32>
    %cst_27 = arith.constant 1.000000e+00 : f32
    %73 = vector.broadcast %cst_27 : f32 to vector<2x128xf32>
    %74 = arith.addf %73, %72 : vector<2x128xf32>
    %75 = arith.divf %73, %74 : vector<2x128xf32>
    %76 = math.tanh %70 : vector<2x128xf32>
    %77 = vector.extract_strided_slice %75 {offsets = [0, 0], sizes = [2, 32], strides = [1, 1]} : vector<2x128xf32> to vector<2x32xf32>
    %78 = vector.extract_strided_slice %75 {offsets = [0, 32], sizes = [2, 32], strides = [1, 1]} : vector<2x128xf32> to vector<2x32xf32>
    %79 = vector.extract_strided_slice %76 {offsets = [0, 64], sizes = [2, 32], strides = [1, 1]} : vector<2x128xf32> to vector<2x32xf32>
    %80 = vector.extract_strided_slice %75 {offsets = [0, 96], sizes = [2, 32], strides = [1, 1]} : vector<2x128xf32> to vector<2x32xf32>
    %81 = arith.mulf %78, %63 : vector<2x32xf32>
    %82 = arith.mulf %77, %79 : vector<2x32xf32>
    %83 = arith.addf %81, %82 : vector<2x32xf32>
    %84 = math.tanh %83 : vector<2x32xf32>
    %85 = arith.mulf %80, %84 : vector<2x32xf32>
    %86 = vector.extract_strided_slice %43 {offsets = [0, 2, 0], sizes = [2, 1, 128], strides = [1, 1, 1]} : vector<2x8x128xf32> to vector<2x1x128xf32>
    %87 = vector.shape_cast %86 : vector<2x1x128xf32> to vector<2x128xf32>
    %88 = arith.truncf %85 : vector<2x32xf32> to vector<2x32xbf16>
    %cst_28 = arith.constant dense<0.000000e+00> : vector<2x128xf32>
    %89 = tpu.matmul %88, %37, %cst_28 {dimension_numbers = #tpu.dot_dimension_numbers<[1], [0], [0], [1], [0, 0, 1, 1], [], []>} : vector<2x32xbf16>, vector<32x128xbf16>, vector<2x128xf32> -> vector<2x128xf32>
    %90 = arith.addf %87, %89 : vector<2x128xf32>
    %91 = arith.negf %90 : vector<2x128xf32>
    %92 = math.exp %91 : vector<2x128xf32>
    %cst_29 = arith.constant 1.000000e+00 : f32
    %93 = vector.broadcast %cst_29 : f32 to vector<2x128xf32>
    %94 = arith.addf %93, %92 : vector<2x128xf32>
    %95 = arith.divf %93, %94 : vector<2x128xf32>
    %96 = math.tanh %90 : vector<2x128xf32>
    %97 = vector.extract_strided_slice %95 {offsets = [0, 0], sizes = [2, 32], strides = [1, 1]} : vector<2x128xf32> to vector<2x32xf32>
    %98 = vector.extract_strided_slice %95 {offsets = [0, 32], sizes = [2, 32], strides = [1, 1]} : vector<2x128xf32> to vector<2x32xf32>
    %99 = vector.extract_strided_slice %96 {offsets = [0, 64], sizes = [2, 32], strides = [1, 1]} : vector<2x128xf32> to vector<2x32xf32>
    %100 = vector.extract_strided_slice %95 {offsets = [0, 96], sizes = [2, 32], strides = [1, 1]} : vector<2x128xf32> to vector<2x32xf32>
    %101 = arith.mulf %98, %83 : vector<2x32xf32>
    %102 = arith.mulf %97, %99 : vector<2x32xf32>
    %103 = arith.addf %101, %102 : vector<2x32xf32>
    %104 = math.tanh %103 : vector<2x32xf32>
    %105 = arith.mulf %100, %104 : vector<2x32xf32>
    %106 = vector.extract_strided_slice %43 {offsets = [0, 3, 0], sizes = [2, 1, 128], strides = [1, 1, 1]} : vector<2x8x128xf32> to vector<2x1x128xf32>
    %107 = vector.shape_cast %106 : vector<2x1x128xf32> to vector<2x128xf32>
    %108 = arith.truncf %105 : vector<2x32xf32> to vector<2x32xbf16>
    %cst_30 = arith.constant dense<0.000000e+00> : vector<2x128xf32>
    %109 = tpu.matmul %108, %37, %cst_30 {dimension_numbers = #tpu.dot_dimension_numbers<[1], [0], [0], [1], [0, 0, 1, 1], [], []>} : vector<2x32xbf16>, vector<32x128xbf16>, vector<2x128xf32> -> vector<2x128xf32>
    %110 = arith.addf %107, %109 : vector<2x128xf32>
    %111 = arith.negf %110 : vector<2x128xf32>
    %112 = math.exp %111 : vector<2x128xf32>
    %cst_31 = arith.constant 1.000000e+00 : f32
    %113 = vector.broadcast %cst_31 : f32 to vector<2x128xf32>
    %114 = arith.addf %113, %112 : vector<2x128xf32>
    %115 = arith.divf %113, %114 : vector<2x128xf32>
    %116 = math.tanh %110 : vector<2x128xf32>
    %117 = vector.extract_strided_slice %115 {offsets = [0, 0], sizes = [2, 32], strides = [1, 1]} : vector<2x128xf32> to vector<2x32xf32>
    %118 = vector.extract_strided_slice %115 {offsets = [0, 32], sizes = [2, 32], strides = [1, 1]} : vector<2x128xf32> to vector<2x32xf32>
    %119 = vector.extract_strided_slice %116 {offsets = [0, 64], sizes = [2, 32], strides = [1, 1]} : vector<2x128xf32> to vector<2x32xf32>
    %120 = vector.extract_strided_slice %115 {offsets = [0, 96], sizes = [2, 32], strides = [1, 1]} : vector<2x128xf32> to vector<2x32xf32>
    %121 = arith.mulf %118, %103 : vector<2x32xf32>
    %122 = arith.mulf %117, %119 : vector<2x32xf32>
    %123 = arith.addf %121, %122 : vector<2x32xf32>
    %124 = math.tanh %123 : vector<2x32xf32>
    %125 = arith.mulf %120, %124 : vector<2x32xf32>
    %126 = vector.extract_strided_slice %43 {offsets = [0, 4, 0], sizes = [2, 1, 128], strides = [1, 1, 1]} : vector<2x8x128xf32> to vector<2x1x128xf32>
    %127 = vector.shape_cast %126 : vector<2x1x128xf32> to vector<2x128xf32>
    %128 = arith.truncf %125 : vector<2x32xf32> to vector<2x32xbf16>
    %cst_32 = arith.constant dense<0.000000e+00> : vector<2x128xf32>
    %129 = tpu.matmul %128, %37, %cst_32 {dimension_numbers = #tpu.dot_dimension_numbers<[1], [0], [0], [1], [0, 0, 1, 1], [], []>} : vector<2x32xbf16>, vector<32x128xbf16>, vector<2x128xf32> -> vector<2x128xf32>
    %130 = arith.addf %127, %129 : vector<2x128xf32>
    %131 = arith.negf %130 : vector<2x128xf32>
    %132 = math.exp %131 : vector<2x128xf32>
    %cst_33 = arith.constant 1.000000e+00 : f32
    %133 = vector.broadcast %cst_33 : f32 to vector<2x128xf32>
    %134 = arith.addf %133, %132 : vector<2x128xf32>
    %135 = arith.divf %133, %134 : vector<2x128xf32>
    %136 = math.tanh %130 : vector<2x128xf32>
    %137 = vector.extract_strided_slice %135 {offsets = [0, 0], sizes = [2, 32], strides = [1, 1]} : vector<2x128xf32> to vector<2x32xf32>
    %138 = vector.extract_strided_slice %135 {offsets = [0, 32], sizes = [2, 32], strides = [1, 1]} : vector<2x128xf32> to vector<2x32xf32>
    %139 = vector.extract_strided_slice %136 {offsets = [0, 64], sizes = [2, 32], strides = [1, 1]} : vector<2x128xf32> to vector<2x32xf32>
    %140 = vector.extract_strided_slice %135 {offsets = [0, 96], sizes = [2, 32], strides = [1, 1]} : vector<2x128xf32> to vector<2x32xf32>
    %141 = arith.mulf %138, %123 : vector<2x32xf32>
    %142 = arith.mulf %137, %139 : vector<2x32xf32>
    %143 = arith.addf %141, %142 : vector<2x32xf32>
    %144 = math.tanh %143 : vector<2x32xf32>
    %145 = arith.mulf %140, %144 : vector<2x32xf32>
    %146 = vector.extract_strided_slice %43 {offsets = [0, 5, 0], sizes = [2, 1, 128], strides = [1, 1, 1]} : vector<2x8x128xf32> to vector<2x1x128xf32>
    %147 = vector.shape_cast %146 : vector<2x1x128xf32> to vector<2x128xf32>
    %148 = arith.truncf %145 : vector<2x32xf32> to vector<2x32xbf16>
    %cst_34 = arith.constant dense<0.000000e+00> : vector<2x128xf32>
    %149 = tpu.matmul %148, %37, %cst_34 {dimension_numbers = #tpu.dot_dimension_numbers<[1], [0], [0], [1], [0, 0, 1, 1], [], []>} : vector<2x32xbf16>, vector<32x128xbf16>, vector<2x128xf32> -> vector<2x128xf32>
    %150 = arith.addf %147, %149 : vector<2x128xf32>
    %151 = arith.negf %150 : vector<2x128xf32>
    %152 = math.exp %151 : vector<2x128xf32>
    %cst_35 = arith.constant 1.000000e+00 : f32
    %153 = vector.broadcast %cst_35 : f32 to vector<2x128xf32>
    %154 = arith.addf %153, %152 : vector<2x128xf32>
    %155 = arith.divf %153, %154 : vector<2x128xf32>
    %156 = math.tanh %150 : vector<2x128xf32>
    %157 = vector.extract_strided_slice %155 {offsets = [0, 0], sizes = [2, 32], strides = [1, 1]} : vector<2x128xf32> to vector<2x32xf32>
    %158 = vector.extract_strided_slice %155 {offsets = [0, 32], sizes = [2, 32], strides = [1, 1]} : vector<2x128xf32> to vector<2x32xf32>
    %159 = vector.extract_strided_slice %156 {offsets = [0, 64], sizes = [2, 32], strides = [1, 1]} : vector<2x128xf32> to vector<2x32xf32>
    %160 = vector.extract_strided_slice %155 {offsets = [0, 96], sizes = [2, 32], strides = [1, 1]} : vector<2x128xf32> to vector<2x32xf32>
    %161 = arith.mulf %158, %143 : vector<2x32xf32>
    %162 = arith.mulf %157, %159 : vector<2x32xf32>
    %163 = arith.addf %161, %162 : vector<2x32xf32>
    %164 = math.tanh %163 : vector<2x32xf32>
    %165 = arith.mulf %160, %164 : vector<2x32xf32>
    %166 = vector.extract_strided_slice %43 {offsets = [0, 6, 0], sizes = [2, 1, 128], strides = [1, 1, 1]} : vector<2x8x128xf32> to vector<2x1x128xf32>
    %167 = vector.shape_cast %166 : vector<2x1x128xf32> to vector<2x128xf32>
    %168 = arith.truncf %165 : vector<2x32xf32> to vector<2x32xbf16>
    %cst_36 = arith.constant dense<0.000000e+00> : vector<2x128xf32>
    %169 = tpu.matmul %168, %37, %cst_36 {dimension_numbers = #tpu.dot_dimension_numbers<[1], [0], [0], [1], [0, 0, 1, 1], [], []>} : vector<2x32xbf16>, vector<32x128xbf16>, vector<2x128xf32> -> vector<2x128xf32>
    %170 = arith.addf %167, %169 : vector<2x128xf32>
    %171 = arith.negf %170 : vector<2x128xf32>
    %172 = math.exp %171 : vector<2x128xf32>
    %cst_37 = arith.constant 1.000000e+00 : f32
    %173 = vector.broadcast %cst_37 : f32 to vector<2x128xf32>
    %174 = arith.addf %173, %172 : vector<2x128xf32>
    %175 = arith.divf %173, %174 : vector<2x128xf32>
    %176 = math.tanh %170 : vector<2x128xf32>
    %177 = vector.extract_strided_slice %175 {offsets = [0, 0], sizes = [2, 32], strides = [1, 1]} : vector<2x128xf32> to vector<2x32xf32>
    %178 = vector.extract_strided_slice %175 {offsets = [0, 32], sizes = [2, 32], strides = [1, 1]} : vector<2x128xf32> to vector<2x32xf32>
    %179 = vector.extract_strided_slice %176 {offsets = [0, 64], sizes = [2, 32], strides = [1, 1]} : vector<2x128xf32> to vector<2x32xf32>
    %180 = vector.extract_strided_slice %175 {offsets = [0, 96], sizes = [2, 32], strides = [1, 1]} : vector<2x128xf32> to vector<2x32xf32>
    %181 = arith.mulf %178, %163 : vector<2x32xf32>
    %182 = arith.mulf %177, %179 : vector<2x32xf32>
    %183 = arith.addf %181, %182 : vector<2x32xf32>
    %184 = math.tanh %183 : vector<2x32xf32>
    %185 = arith.mulf %180, %184 : vector<2x32xf32>
    %186 = vector.extract_strided_slice %43 {offsets = [0, 7, 0], sizes = [2, 1, 128], strides = [1, 1, 1]} : vector<2x8x128xf32> to vector<2x1x128xf32>
    %187 = vector.shape_cast %186 : vector<2x1x128xf32> to vector<2x128xf32>
    %188 = arith.truncf %185 : vector<2x32xf32> to vector<2x32xbf16>
    %cst_38 = arith.constant dense<0.000000e+00> : vector<2x128xf32>
    %189 = tpu.matmul %188, %37, %cst_38 {dimension_numbers = #tpu.dot_dimension_numbers<[1], [0], [0], [1], [0, 0, 1, 1], [], []>} : vector<2x32xbf16>, vector<32x128xbf16>, vector<2x128xf32> -> vector<2x128xf32>
    %190 = arith.addf %187, %189 : vector<2x128xf32>
    %191 = arith.negf %190 : vector<2x128xf32>
    %192 = math.exp %191 : vector<2x128xf32>
    %cst_39 = arith.constant 1.000000e+00 : f32
    %193 = vector.broadcast %cst_39 : f32 to vector<2x128xf32>
    %194 = arith.addf %193, %192 : vector<2x128xf32>
    %195 = arith.divf %193, %194 : vector<2x128xf32>
    %196 = math.tanh %190 : vector<2x128xf32>
    %197 = vector.extract_strided_slice %195 {offsets = [0, 0], sizes = [2, 32], strides = [1, 1]} : vector<2x128xf32> to vector<2x32xf32>
    %198 = vector.extract_strided_slice %195 {offsets = [0, 32], sizes = [2, 32], strides = [1, 1]} : vector<2x128xf32> to vector<2x32xf32>
    %199 = vector.extract_strided_slice %196 {offsets = [0, 64], sizes = [2, 32], strides = [1, 1]} : vector<2x128xf32> to vector<2x32xf32>
    %200 = vector.extract_strided_slice %195 {offsets = [0, 96], sizes = [2, 32], strides = [1, 1]} : vector<2x128xf32> to vector<2x32xf32>
    %201 = arith.mulf %198, %183 : vector<2x32xf32>
    %202 = arith.mulf %197, %199 : vector<2x32xf32>
    %203 = arith.addf %201, %202 : vector<2x32xf32>
    %204 = math.tanh %203 : vector<2x32xf32>
    %205 = arith.mulf %200, %204 : vector<2x32xf32>
    %206 = vector.shape_cast %65 : vector<2x32xf32> to vector<2x1x32xf32>
    %207 = vector.shape_cast %85 : vector<2x32xf32> to vector<2x1x32xf32>
    %208 = vector.shape_cast %105 : vector<2x32xf32> to vector<2x1x32xf32>
    %209 = vector.shape_cast %125 : vector<2x32xf32> to vector<2x1x32xf32>
    %210 = vector.shape_cast %145 : vector<2x32xf32> to vector<2x1x32xf32>
    %211 = vector.shape_cast %165 : vector<2x32xf32> to vector<2x1x32xf32>
    %212 = vector.shape_cast %185 : vector<2x32xf32> to vector<2x1x32xf32>
    %213 = vector.shape_cast %205 : vector<2x32xf32> to vector<2x1x32xf32>
    %214 = tpu.concatenate %206, %207, %208, %209, %210, %211, %212, %213 in 1 : vector<2x1x32xf32>, vector<2x1x32xf32>, vector<2x1x32xf32>, vector<2x1x32xf32>, vector<2x1x32xf32>, vector<2x1x32xf32>, vector<2x1x32xf32>, vector<2x1x32xf32> -> vector<2x8x32xf32>
    %215 = vector.shape_cast %214 : vector<2x8x32xf32> to vector<16x32xf32>
    %c0_40 = arith.constant 0 : index
    %c0_41 = arith.constant 0 : index
    %216 = vector.load %arg9[%c0_40, %c0_41] : memref<32x128xbf16, #tpu.memory_space<vmem>>, vector<32x128xbf16>
    %c0_42 = arith.constant 0 : index
    %c0_43 = arith.constant 0 : index
    %217 = vector.load %arg10[%c0_42, %c0_43] : memref<32x128xbf16, #tpu.memory_space<vmem>>, vector<32x128xbf16>
    %c0_44 = arith.constant 0 : index
    %c0_45 = arith.constant 0 : index
    %218 = vector.load %arg11[%c0_44, %c0_45] : memref<1x128xf32, #tpu.memory_space<vmem>>, vector<1x128xf32>
    %219 = arith.truncf %215 : vector<16x32xf32> to vector<16x32xbf16>
    %cst_46 = arith.constant dense<0.000000e+00> : vector<16x128xf32>
    %220 = tpu.matmul %219, %216, %cst_46 {dimension_numbers = #tpu.dot_dimension_numbers<[1], [0], [0], [1], [0, 0, 1, 1], [], []>} : vector<16x32xbf16>, vector<32x128xbf16>, vector<16x128xf32> -> vector<16x128xf32>
    %221 = vector.broadcast %218 : vector<1x128xf32> to vector<16x128xf32>
    %222 = arith.addf %220, %221 : vector<16x128xf32>
    %223 = vector.shape_cast %222 : vector<16x128xf32> to vector<2x8x128xf32>
    %cst_47 = arith.constant 0.000000e+00 : f32
    %224 = vector.broadcast %cst_47 : f32 to vector<2x32xf32>
    %cst_48 = arith.constant 0.000000e+00 : f32
    %225 = vector.broadcast %cst_48 : f32 to vector<2x32xf32>
    %226 = vector.extract_strided_slice %223 {offsets = [0, 0, 0], sizes = [2, 1, 128], strides = [1, 1, 1]} : vector<2x8x128xf32> to vector<2x1x128xf32>
    %227 = vector.shape_cast %226 : vector<2x1x128xf32> to vector<2x128xf32>
    %228 = arith.truncf %224 : vector<2x32xf32> to vector<2x32xbf16>
    %cst_49 = arith.constant dense<0.000000e+00> : vector<2x128xf32>
    %229 = tpu.matmul %228, %217, %cst_49 {dimension_numbers = #tpu.dot_dimension_numbers<[1], [0], [0], [1], [0, 0, 1, 1], [], []>} : vector<2x32xbf16>, vector<32x128xbf16>, vector<2x128xf32> -> vector<2x128xf32>
    %230 = arith.addf %227, %229 : vector<2x128xf32>
    %231 = arith.negf %230 : vector<2x128xf32>
    %232 = math.exp %231 : vector<2x128xf32>
    %cst_50 = arith.constant 1.000000e+00 : f32
    %233 = vector.broadcast %cst_50 : f32 to vector<2x128xf32>
    %234 = arith.addf %233, %232 : vector<2x128xf32>
    %235 = arith.divf %233, %234 : vector<2x128xf32>
    %236 = math.tanh %230 : vector<2x128xf32>
    %237 = vector.extract_strided_slice %235 {offsets = [0, 0], sizes = [2, 32], strides = [1, 1]} : vector<2x128xf32> to vector<2x32xf32>
    %238 = vector.extract_strided_slice %235 {offsets = [0, 32], sizes = [2, 32], strides = [1, 1]} : vector<2x128xf32> to vector<2x32xf32>
    %239 = vector.extract_strided_slice %236 {offsets = [0, 64], sizes = [2, 32], strides = [1, 1]} : vector<2x128xf32> to vector<2x32xf32>
    %240 = vector.extract_strided_slice %235 {offsets = [0, 96], sizes = [2, 32], strides = [1, 1]} : vector<2x128xf32> to vector<2x32xf32>
    %241 = arith.mulf %238, %225 : vector<2x32xf32>
    %242 = arith.mulf %237, %239 : vector<2x32xf32>
    %243 = arith.addf %241, %242 : vector<2x32xf32>
    %244 = math.tanh %243 : vector<2x32xf32>
    %245 = arith.mulf %240, %244 : vector<2x32xf32>
    %246 = vector.extract_strided_slice %223 {offsets = [0, 1, 0], sizes = [2, 1, 128], strides = [1, 1, 1]} : vector<2x8x128xf32> to vector<2x1x128xf32>
    %247 = vector.shape_cast %246 : vector<2x1x128xf32> to vector<2x128xf32>
    %248 = arith.truncf %245 : vector<2x32xf32> to vector<2x32xbf16>
    %cst_51 = arith.constant dense<0.000000e+00> : vector<2x128xf32>
    %249 = tpu.matmul %248, %217, %cst_51 {dimension_numbers = #tpu.dot_dimension_numbers<[1], [0], [0], [1], [0, 0, 1, 1], [], []>} : vector<2x32xbf16>, vector<32x128xbf16>, vector<2x128xf32> -> vector<2x128xf32>
    %250 = arith.addf %247, %249 : vector<2x128xf32>
    %251 = arith.negf %250 : vector<2x128xf32>
    %252 = math.exp %251 : vector<2x128xf32>
    %cst_52 = arith.constant 1.000000e+00 : f32
    %253 = vector.broadcast %cst_52 : f32 to vector<2x128xf32>
    %254 = arith.addf %253, %252 : vector<2x128xf32>
    %255 = arith.divf %253, %254 : vector<2x128xf32>
    %256 = math.tanh %250 : vector<2x128xf32>
    %257 = vector.extract_strided_slice %255 {offsets = [0, 0], sizes = [2, 32], strides = [1, 1]} : vector<2x128xf32> to vector<2x32xf32>
    %258 = vector.extract_strided_slice %255 {offsets = [0, 32], sizes = [2, 32], strides = [1, 1]} : vector<2x128xf32> to vector<2x32xf32>
    %259 = vector.extract_strided_slice %256 {offsets = [0, 64], sizes = [2, 32], strides = [1, 1]} : vector<2x128xf32> to vector<2x32xf32>
    %260 = vector.extract_strided_slice %255 {offsets = [0, 96], sizes = [2, 32], strides = [1, 1]} : vector<2x128xf32> to vector<2x32xf32>
    %261 = arith.mulf %258, %243 : vector<2x32xf32>
    %262 = arith.mulf %257, %259 : vector<2x32xf32>
    %263 = arith.addf %261, %262 : vector<2x32xf32>
    %264 = math.tanh %263 : vector<2x32xf32>
    %265 = arith.mulf %260, %264 : vector<2x32xf32>
    %266 = vector.extract_strided_slice %223 {offsets = [0, 2, 0], sizes = [2, 1, 128], strides = [1, 1, 1]} : vector<2x8x128xf32> to vector<2x1x128xf32>
    %267 = vector.shape_cast %266 : vector<2x1x128xf32> to vector<2x128xf32>
    %268 = arith.truncf %265 : vector<2x32xf32> to vector<2x32xbf16>
    %cst_53 = arith.constant dense<0.000000e+00> : vector<2x128xf32>
    %269 = tpu.matmul %268, %217, %cst_53 {dimension_numbers = #tpu.dot_dimension_numbers<[1], [0], [0], [1], [0, 0, 1, 1], [], []>} : vector<2x32xbf16>, vector<32x128xbf16>, vector<2x128xf32> -> vector<2x128xf32>
    %270 = arith.addf %267, %269 : vector<2x128xf32>
    %271 = arith.negf %270 : vector<2x128xf32>
    %272 = math.exp %271 : vector<2x128xf32>
    %cst_54 = arith.constant 1.000000e+00 : f32
    %273 = vector.broadcast %cst_54 : f32 to vector<2x128xf32>
    %274 = arith.addf %273, %272 : vector<2x128xf32>
    %275 = arith.divf %273, %274 : vector<2x128xf32>
    %276 = math.tanh %270 : vector<2x128xf32>
    %277 = vector.extract_strided_slice %275 {offsets = [0, 0], sizes = [2, 32], strides = [1, 1]} : vector<2x128xf32> to vector<2x32xf32>
    %278 = vector.extract_strided_slice %275 {offsets = [0, 32], sizes = [2, 32], strides = [1, 1]} : vector<2x128xf32> to vector<2x32xf32>
    %279 = vector.extract_strided_slice %276 {offsets = [0, 64], sizes = [2, 32], strides = [1, 1]} : vector<2x128xf32> to vector<2x32xf32>
    %280 = vector.extract_strided_slice %275 {offsets = [0, 96], sizes = [2, 32], strides = [1, 1]} : vector<2x128xf32> to vector<2x32xf32>
    %281 = arith.mulf %278, %263 : vector<2x32xf32>
    %282 = arith.mulf %277, %279 : vector<2x32xf32>
    %283 = arith.addf %281, %282 : vector<2x32xf32>
    %284 = math.tanh %283 : vector<2x32xf32>
    %285 = arith.mulf %280, %284 : vector<2x32xf32>
    %286 = vector.extract_strided_slice %223 {offsets = [0, 3, 0], sizes = [2, 1, 128], strides = [1, 1, 1]} : vector<2x8x128xf32> to vector<2x1x128xf32>
    %287 = vector.shape_cast %286 : vector<2x1x128xf32> to vector<2x128xf32>
    %288 = arith.truncf %285 : vector<2x32xf32> to vector<2x32xbf16>
    %cst_55 = arith.constant dense<0.000000e+00> : vector<2x128xf32>
    %289 = tpu.matmul %288, %217, %cst_55 {dimension_numbers = #tpu.dot_dimension_numbers<[1], [0], [0], [1], [0, 0, 1, 1], [], []>} : vector<2x32xbf16>, vector<32x128xbf16>, vector<2x128xf32> -> vector<2x128xf32>
    %290 = arith.addf %287, %289 : vector<2x128xf32>
    %291 = arith.negf %290 : vector<2x128xf32>
    %292 = math.exp %291 : vector<2x128xf32>
    %cst_56 = arith.constant 1.000000e+00 : f32
    %293 = vector.broadcast %cst_56 : f32 to vector<2x128xf32>
    %294 = arith.addf %293, %292 : vector<2x128xf32>
    %295 = arith.divf %293, %294 : vector<2x128xf32>
    %296 = math.tanh %290 : vector<2x128xf32>
    %297 = vector.extract_strided_slice %295 {offsets = [0, 0], sizes = [2, 32], strides = [1, 1]} : vector<2x128xf32> to vector<2x32xf32>
    %298 = vector.extract_strided_slice %295 {offsets = [0, 32], sizes = [2, 32], strides = [1, 1]} : vector<2x128xf32> to vector<2x32xf32>
    %299 = vector.extract_strided_slice %296 {offsets = [0, 64], sizes = [2, 32], strides = [1, 1]} : vector<2x128xf32> to vector<2x32xf32>
    %300 = vector.extract_strided_slice %295 {offsets = [0, 96], sizes = [2, 32], strides = [1, 1]} : vector<2x128xf32> to vector<2x32xf32>
    %301 = arith.mulf %298, %283 : vector<2x32xf32>
    %302 = arith.mulf %297, %299 : vector<2x32xf32>
    %303 = arith.addf %301, %302 : vector<2x32xf32>
    %304 = math.tanh %303 : vector<2x32xf32>
    %305 = arith.mulf %300, %304 : vector<2x32xf32>
    %306 = vector.extract_strided_slice %223 {offsets = [0, 4, 0], sizes = [2, 1, 128], strides = [1, 1, 1]} : vector<2x8x128xf32> to vector<2x1x128xf32>
    %307 = vector.shape_cast %306 : vector<2x1x128xf32> to vector<2x128xf32>
    %308 = arith.truncf %305 : vector<2x32xf32> to vector<2x32xbf16>
    %cst_57 = arith.constant dense<0.000000e+00> : vector<2x128xf32>
    %309 = tpu.matmul %308, %217, %cst_57 {dimension_numbers = #tpu.dot_dimension_numbers<[1], [0], [0], [1], [0, 0, 1, 1], [], []>} : vector<2x32xbf16>, vector<32x128xbf16>, vector<2x128xf32> -> vector<2x128xf32>
    %310 = arith.addf %307, %309 : vector<2x128xf32>
    %311 = arith.negf %310 : vector<2x128xf32>
    %312 = math.exp %311 : vector<2x128xf32>
    %cst_58 = arith.constant 1.000000e+00 : f32
    %313 = vector.broadcast %cst_58 : f32 to vector<2x128xf32>
    %314 = arith.addf %313, %312 : vector<2x128xf32>
    %315 = arith.divf %313, %314 : vector<2x128xf32>
    %316 = math.tanh %310 : vector<2x128xf32>
    %317 = vector.extract_strided_slice %315 {offsets = [0, 0], sizes = [2, 32], strides = [1, 1]} : vector<2x128xf32> to vector<2x32xf32>
    %318 = vector.extract_strided_slice %315 {offsets = [0, 32], sizes = [2, 32], strides = [1, 1]} : vector<2x128xf32> to vector<2x32xf32>
    %319 = vector.extract_strided_slice %316 {offsets = [0, 64], sizes = [2, 32], strides = [1, 1]} : vector<2x128xf32> to vector<2x32xf32>
    %320 = vector.extract_strided_slice %315 {offsets = [0, 96], sizes = [2, 32], strides = [1, 1]} : vector<2x128xf32> to vector<2x32xf32>
    %321 = arith.mulf %318, %303 : vector<2x32xf32>
    %322 = arith.mulf %317, %319 : vector<2x32xf32>
    %323 = arith.addf %321, %322 : vector<2x32xf32>
    %324 = math.tanh %323 : vector<2x32xf32>
    %325 = arith.mulf %320, %324 : vector<2x32xf32>
    %326 = vector.extract_strided_slice %223 {offsets = [0, 5, 0], sizes = [2, 1, 128], strides = [1, 1, 1]} : vector<2x8x128xf32> to vector<2x1x128xf32>
    %327 = vector.shape_cast %326 : vector<2x1x128xf32> to vector<2x128xf32>
    %328 = arith.truncf %325 : vector<2x32xf32> to vector<2x32xbf16>
    %cst_59 = arith.constant dense<0.000000e+00> : vector<2x128xf32>
    %329 = tpu.matmul %328, %217, %cst_59 {dimension_numbers = #tpu.dot_dimension_numbers<[1], [0], [0], [1], [0, 0, 1, 1], [], []>} : vector<2x32xbf16>, vector<32x128xbf16>, vector<2x128xf32> -> vector<2x128xf32>
    %330 = arith.addf %327, %329 : vector<2x128xf32>
    %331 = arith.negf %330 : vector<2x128xf32>
    %332 = math.exp %331 : vector<2x128xf32>
    %cst_60 = arith.constant 1.000000e+00 : f32
    %333 = vector.broadcast %cst_60 : f32 to vector<2x128xf32>
    %334 = arith.addf %333, %332 : vector<2x128xf32>
    %335 = arith.divf %333, %334 : vector<2x128xf32>
    %336 = math.tanh %330 : vector<2x128xf32>
    %337 = vector.extract_strided_slice %335 {offsets = [0, 0], sizes = [2, 32], strides = [1, 1]} : vector<2x128xf32> to vector<2x32xf32>
    %338 = vector.extract_strided_slice %335 {offsets = [0, 32], sizes = [2, 32], strides = [1, 1]} : vector<2x128xf32> to vector<2x32xf32>
    %339 = vector.extract_strided_slice %336 {offsets = [0, 64], sizes = [2, 32], strides = [1, 1]} : vector<2x128xf32> to vector<2x32xf32>
    %340 = vector.extract_strided_slice %335 {offsets = [0, 96], sizes = [2, 32], strides = [1, 1]} : vector<2x128xf32> to vector<2x32xf32>
    %341 = arith.mulf %338, %323 : vector<2x32xf32>
    %342 = arith.mulf %337, %339 : vector<2x32xf32>
    %343 = arith.addf %341, %342 : vector<2x32xf32>
    %344 = math.tanh %343 : vector<2x32xf32>
    %345 = arith.mulf %340, %344 : vector<2x32xf32>
    %346 = vector.extract_strided_slice %223 {offsets = [0, 6, 0], sizes = [2, 1, 128], strides = [1, 1, 1]} : vector<2x8x128xf32> to vector<2x1x128xf32>
    %347 = vector.shape_cast %346 : vector<2x1x128xf32> to vector<2x128xf32>
    %348 = arith.truncf %345 : vector<2x32xf32> to vector<2x32xbf16>
    %cst_61 = arith.constant dense<0.000000e+00> : vector<2x128xf32>
    %349 = tpu.matmul %348, %217, %cst_61 {dimension_numbers = #tpu.dot_dimension_numbers<[1], [0], [0], [1], [0, 0, 1, 1], [], []>} : vector<2x32xbf16>, vector<32x128xbf16>, vector<2x128xf32> -> vector<2x128xf32>
    %350 = arith.addf %347, %349 : vector<2x128xf32>
    %351 = arith.negf %350 : vector<2x128xf32>
    %352 = math.exp %351 : vector<2x128xf32>
    %cst_62 = arith.constant 1.000000e+00 : f32
    %353 = vector.broadcast %cst_62 : f32 to vector<2x128xf32>
    %354 = arith.addf %353, %352 : vector<2x128xf32>
    %355 = arith.divf %353, %354 : vector<2x128xf32>
    %356 = math.tanh %350 : vector<2x128xf32>
    %357 = vector.extract_strided_slice %355 {offsets = [0, 0], sizes = [2, 32], strides = [1, 1]} : vector<2x128xf32> to vector<2x32xf32>
    %358 = vector.extract_strided_slice %355 {offsets = [0, 32], sizes = [2, 32], strides = [1, 1]} : vector<2x128xf32> to vector<2x32xf32>
    %359 = vector.extract_strided_slice %356 {offsets = [0, 64], sizes = [2, 32], strides = [1, 1]} : vector<2x128xf32> to vector<2x32xf32>
    %360 = vector.extract_strided_slice %355 {offsets = [0, 96], sizes = [2, 32], strides = [1, 1]} : vector<2x128xf32> to vector<2x32xf32>
    %361 = arith.mulf %358, %343 : vector<2x32xf32>
    %362 = arith.mulf %357, %359 : vector<2x32xf32>
    %363 = arith.addf %361, %362 : vector<2x32xf32>
    %364 = math.tanh %363 : vector<2x32xf32>
    %365 = arith.mulf %360, %364 : vector<2x32xf32>
    %366 = vector.extract_strided_slice %223 {offsets = [0, 7, 0], sizes = [2, 1, 128], strides = [1, 1, 1]} : vector<2x8x128xf32> to vector<2x1x128xf32>
    %367 = vector.shape_cast %366 : vector<2x1x128xf32> to vector<2x128xf32>
    %368 = arith.truncf %365 : vector<2x32xf32> to vector<2x32xbf16>
    %cst_63 = arith.constant dense<0.000000e+00> : vector<2x128xf32>
    %369 = tpu.matmul %368, %217, %cst_63 {dimension_numbers = #tpu.dot_dimension_numbers<[1], [0], [0], [1], [0, 0, 1, 1], [], []>} : vector<2x32xbf16>, vector<32x128xbf16>, vector<2x128xf32> -> vector<2x128xf32>
    %370 = arith.addf %367, %369 : vector<2x128xf32>
    %371 = arith.negf %370 : vector<2x128xf32>
    %372 = math.exp %371 : vector<2x128xf32>
    %cst_64 = arith.constant 1.000000e+00 : f32
    %373 = vector.broadcast %cst_64 : f32 to vector<2x128xf32>
    %374 = arith.addf %373, %372 : vector<2x128xf32>
    %375 = arith.divf %373, %374 : vector<2x128xf32>
    %376 = math.tanh %370 : vector<2x128xf32>
    %377 = vector.extract_strided_slice %375 {offsets = [0, 0], sizes = [2, 32], strides = [1, 1]} : vector<2x128xf32> to vector<2x32xf32>
    %378 = vector.extract_strided_slice %375 {offsets = [0, 32], sizes = [2, 32], strides = [1, 1]} : vector<2x128xf32> to vector<2x32xf32>
    %379 = vector.extract_strided_slice %376 {offsets = [0, 64], sizes = [2, 32], strides = [1, 1]} : vector<2x128xf32> to vector<2x32xf32>
    %380 = vector.extract_strided_slice %375 {offsets = [0, 96], sizes = [2, 32], strides = [1, 1]} : vector<2x128xf32> to vector<2x32xf32>
    %381 = arith.mulf %378, %363 : vector<2x32xf32>
    %382 = arith.mulf %377, %379 : vector<2x32xf32>
    %383 = arith.addf %381, %382 : vector<2x32xf32>
    %384 = math.tanh %383 : vector<2x32xf32>
    %385 = arith.mulf %380, %384 : vector<2x32xf32>
    %386 = arith.truncf %385 : vector<2x32xf32> to vector<2x32xbf16>
    %c0_65 = arith.constant 0 : index
    %c0_66 = arith.constant 0 : index
    %387 = vector.load %arg12[%c0_65, %c0_66] : memref<32x4xbf16, #tpu.memory_space<vmem>>, vector<32x4xbf16>
    %cst_67 = arith.constant dense<0.000000e+00> : vector<2x4xf32>
    %388 = tpu.matmul %386, %387, %cst_67 {dimension_numbers = #tpu.dot_dimension_numbers<[1], [0], [0], [1], [0, 0, 1, 1], [], []>} : vector<2x32xbf16>, vector<32x4xbf16>, vector<2x4xf32> -> vector<2x4xf32>
    %c0_68 = arith.constant 0 : index
    %c0_69 = arith.constant 0 : index
    %389 = vector.load %arg13[%c0_68, %c0_69] : memref<1x4xf32, #tpu.memory_space<vmem>>, vector<1x4xf32>
    %390 = vector.broadcast %389 : vector<1x4xf32> to vector<2x4xf32>
    %391 = arith.addf %388, %390 : vector<2x4xf32>
    %c0_70 = arith.constant 0 : index
    %c0_71 = arith.constant 0 : index
    %392 = vector.load %arg14[%c0_70, %c0_71] : memref<2x4xf32, #tpu.memory_space<vmem>>, vector<2x4xf32>
    tpu.vector_store %arg14[%c0_70, %c0_71], %391 {strides = array<i32>} : memref<2x4xf32, #tpu.memory_space<vmem>>, vector<2x4xf32>,
    return
  }
  func.func @transform_0(%arg0: i32) -> (i32, i32, i32) {
    %c0_i32 = arith.constant 0 : i32
    %c0_i32_0 = arith.constant 0 : i32
    %c0_i32_1 = arith.constant 0 : i32
    return %arg0, %c0_i32, %c0_i32_0 : i32, i32, i32
  }
  func.func @transform_1(%arg0: i32) -> (i32, i32) {
    %c0_i32 = arith.constant 0 : i32
    %c0_i32_0 = arith.constant 0 : i32
    %c0_i32_1 = arith.constant 0 : i32
    return %c0_i32, %c0_i32_0 : i32, i32
  }
  func.func @transform_2(%arg0: i32) -> (i32, i32) {
    %c0_i32 = arith.constant 0 : i32
    %c0_i32_0 = arith.constant 0 : i32
    %c0_i32_1 = arith.constant 0 : i32
    return %c0_i32, %c0_i32_0 : i32, i32
  }
  func.func @transform_3(%arg0: i32) -> (i32, i32) {
    %c0_i32 = arith.constant 0 : i32
    %c0_i32_0 = arith.constant 0 : i32
    %c0_i32_1 = arith.constant 0 : i32
    return %c0_i32, %c0_i32_0 : i32, i32
  }
  func.func @transform_4(%arg0: i32) -> (i32, i32) {
    %c0_i32 = arith.constant 0 : i32
    %c0_i32_0 = arith.constant 0 : i32
    %c0_i32_1 = arith.constant 0 : i32
    return %c0_i32, %c0_i32_0 : i32, i32
  }
  func.func @transform_5(%arg0: i32) -> (i32, i32) {
    %c0_i32 = arith.constant 0 : i32
    %c0_i32_0 = arith.constant 0 : i32
    %c0_i32_1 = arith.constant 0 : i32
    return %c0_i32, %c0_i32_0 : i32, i32
  }
  func.func @transform_6(%arg0: i32) -> (i32, i32) {
    %c0_i32 = arith.constant 0 : i32
    %c0_i32_0 = arith.constant 0 : i32
    %c0_i32_1 = arith.constant 0 : i32
    return %c0_i32, %c0_i32_0 : i32, i32
  }
  func.func @transform_7(%arg0: i32) -> (i32, i32) {
    %c0_i32 = arith.constant 0 : i32
    %c0_i32_0 = arith.constant 0 : i32
    %c0_i32_1 = arith.constant 0 : i32
    return %c0_i32, %c0_i32_0 : i32, i32
  }
  func.func @transform_8(%arg0: i32) -> (i32, i32) {
    %c0_i32 = arith.constant 0 : i32
    %c0_i32_0 = arith.constant 0 : i32
    %c0_i32_1 = arith.constant 0 : i32
    return %c0_i32, %c0_i32_0 : i32, i32
  }
  func.func @transform_9(%arg0: i32) -> (i32, i32) {
    %c0_i32 = arith.constant 0 : i32
    %c0_i32_0 = arith.constant 0 : i32
    %c0_i32_1 = arith.constant 0 : i32
    return %c0_i32, %c0_i32_0 : i32, i32
  }
  func.func @transform_10(%arg0: i32) -> (i32, i32) {
    %c0_i32 = arith.constant 0 : i32
    %c0_i32_0 = arith.constant 0 : i32
    %c0_i32_1 = arith.constant 0 : i32
    return %c0_i32, %c0_i32_0 : i32, i32
  }
  func.func @transform_11(%arg0: i32) -> (i32, i32) {
    %c0_i32 = arith.constant 0 : i32
    %c0_i32_0 = arith.constant 0 : i32
    %c0_i32_1 = arith.constant 0 : i32
    return %c0_i32, %c0_i32_0 : i32, i32
  }
  func.func @transform_12(%arg0: i32) -> (i32, i32) {
    %c0_i32 = arith.constant 0 : i32
    %c0_i32_0 = arith.constant 0 : i32
    %c0_i32_1 = arith.constant 0 : i32
    return %c0_i32, %c0_i32_0 : i32, i32
  }
  func.func @transform_13(%arg0: i32) -> (i32, i32) {
    %c0_i32 = arith.constant 0 : i32
    %c0_i32_0 = arith.constant 0 : i32
    return %arg0, %c0_i32 : i32, i32
  }
}

</mosaic_0001>

<bundles_post_ra>
// kernel: tpu_custom_call.1
= control target key start
LH: loop header
LB: loop body
LE: loop exit
PB: predicated region body
PF: predicated region fallthrough
CT: control target
= control target key end

     0   :  { %18 = vsyncpa [#allocation3], 0  ;;  %s4067_s0 = inlined_call_operand.vmem [shape: f32[2,8,16], index: 0, kind: input, shape index: {}]   ;;  %s4068_s1 = inlined_call_operand.hbm [shape: bf16[16,48], index: 1, kind: input, shape index: {}]   ;;  %s4069_s2 = inlined_call_operand.hbm [shape: f32[1,48], index: 2, kind: input, shape index: {}]   ;;  %s4070_s3 = inlined_call_operand.hbm [shape: bf16[16,16], index: 3, kind: input, shape index: {}]   ;;  %s4071_s4 = inlined_call_operand.hbm [shape: f32[1,16], index: 4, kind: input, shape index: {}]   ;;  %s4072_s5 = inlined_call_operand.hbm [shape: bf16[16,128], index: 5, kind: input, shape index: {}]   ;;  %s4073_s6 = inlined_call_operand.vmem [shape: bf16[32,128], index: 6, kind: input, shape index: {}]   ;;  %s4074_s7 = inlined_call_operand.hbm [shape: f32[1,128], index: 7, kind: input, shape index: {}]   ;;  %s4075_s8 = inlined_call_operand.vmem [shape: bf16[32,128], index: 8, kind: input, shape index: {}]   ;;  %s4076_s9 = inlined_call_operand.hbm [shape: bf16[32,128], index: 9, kind: input, shape index: {}]   ;;  %s4077_s10 = inlined_call_operand.vmem [shape: f32[1,128], index: 10, kind: input, shape index: {}]   ;;  %s4078_s11 = inlined_call_operand.vmem [shape: bf16[32,4], index: 11, kind: input, shape index: {}]   ;;  %s4079_s12 = inlined_call_operand.vmem [shape: f32[1,4], index: 12, kind: input, shape index: {}]   ;;  %s4080_s13 = inlined_call_operand.hbm [shape: f32[2,4], index: 13, kind: output, shape index: {}]  }
   0x1   :  { %19 = vsyncpa [#allocation6], 0 }
   0x2   :  { %20 = vsyncpa [#allocation9], 0 }
   0x3   :  { %21 = vsyncpa [#allocation12], 0 }
   0x4   :  { %22 = vsyncpa [#allocation4], 0  ;;  %s3376_s25 = smov [#allocation5]   ;;  %s3377_s27 = smov [#allocation8]  }
   0x5   :  { %s43_s26 = sshll.u32 %s3376_s25, 4  ;;  %s65_s28 = sshll.u32 %s3377_s27, 4  ;;  %s44_s26 = int_to_ptr.vmem [resolvable:$true] %s43_s26  ;;  %s66_s28 = int_to_ptr.vmem [resolvable:$true] %s65_s28 }
   0x6   :  { %s3190_s14 = scalar_lea.hbm %s4069_s2, 16 }
   0x7   :  { %p3191_p0 = scmp.ne.s32.totalorder %s4069_s2, %s3190_s14  ;;  %p3194_p1 = scmp.lt.u32.totalorder %s3190_s14, %s4069_s2 }
   0x9   :  { %p3196_p2 = pnand %p3194_p1, %p3191_p0 }
   0xb   :  { %3199 = shalt.err (!%p3196_p2)
}
   0xc   :  { %s3200_s19 = scalar_lea.vmem %s44_s26, 16  ;;  %s3204_s20 = scalar_lea.vmem %s44_s26, 32 }
   0xd   :  { %p3201_p3 = scmp.ne.s32.totalorder %s44_s26, %s3200_s19  ;;  %p3205_p4 = scmp.lt.s32.totalorder %s44_s26, %s44_s26 }
   0xe   :  { %p3206_p5 = scmp.lt.s32.totalorder %s3204_s20, %s3200_s19 }
  0x10   :  { %p3207_p6 = por %p3206_p5, %p3205_p4 }
  0x12   :  { %p3208_p7 = pnand %p3207_p6, %p3201_p3 }
  0x14   :  { %3211 = shalt.err (!%p3208_p7)
}
  0x15   :  { %46 = dma.hbm_to_vmem [thread:$0]  %s4069_s2, 16, %s44_s26, [#allocation6]  }
  0x16   :  { %s3212_s25 = scalar_lea.hbm %s4071_s4, 16 }
  0x17   :  { %p3213_p8 = scmp.ne.s32.totalorder %s4071_s4, %s3212_s25  ;;  %p3216_p9 = scmp.lt.u32.totalorder %s3212_s25, %s4071_s4 }
  0x19   :  { %p3218_p10 = pnand %p3216_p9, %p3213_p8 }
  0x1b   :  { %3221 = shalt.err (!%p3218_p10)
}
  0x1c   :  { %s3222_s15 = scalar_lea.vmem %s66_s28, 16  ;;  %s3226_s16 = scalar_lea.vmem %s66_s28, 32 }
  0x1d   :  { %p3223_p11 = scmp.ne.s32.totalorder %s66_s28, %s3222_s15  ;;  %p3227_p12 = scmp.lt.s32.totalorder %s66_s28, %s66_s28 }
  0x1e   :  { %p3228_p13 = scmp.lt.s32.totalorder %s3226_s16, %s3222_s15 }
  0x20   :  { %p3229_p0 = por %p3228_p13, %p3227_p12 }
  0x22   :  { %p3230_p1 = pnand %p3229_p0, %p3223_p11 }
  0x24   :  { %3233 = shalt.err (!%p3230_p1)
}
  0x25   :  { %68 = dma.hbm_to_vmem [thread:$0]  %s4071_s4, 16, %s66_s28, [#allocation9]  }
  0x26   :  { %s3378_s17 = smov [#allocation11]   ;;  %s3379_s19 = smov [#allocation2]  }
  0x27   :  { %s89_s18 = sshll.u32 %s3378_s17, 4  ;;  %s30_s20 = sshll.u32 %s3379_s19, 4  ;;  %s90_s18 = int_to_ptr.vmem [resolvable:$true] %s89_s18  ;;  %s3486_s20 = int_to_ptr.vmem [resolvable:$true] %s30_s20 }
  0x28   :  { %s3234_s23 = scalar_lea.hbm %s4074_s7, 16 }
  0x29   :  { %p3235_p2 = scmp.ne.s32.totalorder %s4074_s7, %s3234_s23  ;;  %p3238_p3 = scmp.lt.u32.totalorder %s3234_s23, %s4074_s7 }
  0x2b   :  { %p3240_p4 = pnand %p3238_p3, %p3235_p2 }
  0x2d   :  { %3243 = shalt.err (!%p3240_p4)
}
  0x2e   :  { %s3244_s4 = scalar_lea.vmem %s90_s18, 16  ;;  %s3248_s28 = scalar_lea.vmem %s90_s18, 32 }
  0x2f   :  { %p3245_p5 = scmp.ne.s32.totalorder %s90_s18, %s3244_s4  ;;  %p3249_p6 = scmp.lt.s32.totalorder %s90_s18, %s90_s18 }
  0x30   :  { %p3250_p7 = scmp.lt.s32.totalorder %s3248_s28, %s3244_s4 }
  0x32   :  { %p3251_p8 = por %p3250_p7, %p3249_p6 }
  0x34   :  { %p3252_p9 = pnand %p3251_p8, %p3245_p5 }
  0x36   :  { %3255 = shalt.err (!%p3252_p9)
}
  0x37   :  { %92 = dma.hbm_to_vmem [thread:$0]  %s4074_s7, 16, %s90_s18, [#allocation12]  }
  0x38   :  { %s3256_s2 = scalar_lea.hbm %s4068_s1, 128 }
  0x39   :  { %p3257_p10 = scmp.ne.s32.totalorder %s4068_s1, %s3256_s2  ;;  %p3260_p11 = scmp.lt.u32.totalorder %s3256_s2, %s4068_s1 }
  0x3b   :  { %p3262_p12 = pnand %p3260_p11, %p3257_p10 }
  0x3d   :  { %3265 = shalt.err (!%p3262_p12)
}
  0x3e   :  { %s3266_s22 = scalar_lea.vmem %s3486_s20, 128  ;;  %p3271_p0 = scmp.lt.s32.totalorder %s3486_s20, %s3486_s20 }
  0x3f   :  { %p3267_p13 = scmp.ne.s32.totalorder %s3486_s20, %s3266_s22  ;;  %p3272_p1 = scmp.lt.s32.totalorder %s3266_s22, %s3266_s22 }
  0x41   :  { %p3273_p2 = por %p3272_p1, %p3271_p0 }
  0x43   :  { %p3274_p3 = pnand %p3273_p2, %p3267_p13 }
  0x45   :  { %3277 = shalt.err (!%p3274_p3)
}
  0x46   :  { %s3380_s7 = smov 64   ;;  %s3381_s18 = smov 4  }
  0x47   :  { %36 = dma.hbm_to_vmem [thread:$0]  %s4068_s1, 128, %s3486_s20, [#allocation3], %s3380_s7, %s3380_s7, %s3381_s18  }
  0x48   :  { %s3382_s25 = smov [#allocation7]   ;;  %s3383_s29 = smov [#allocation10]  }
  0x49   :  { %s52_s27 = sshll.u32 %s3382_s25, 4  ;;  %s74_s4 = sshll.u32 %s3383_s29, 4  ;;  %s53_s27 = int_to_ptr.vmem [resolvable:$true] %s52_s27  ;;  %s3520_s4 = int_to_ptr.vmem [resolvable:$true] %s74_s4 }
  0x4a   :  { %s3278_s14 = scalar_lea.hbm %s4070_s3, 128 }
  0x4b   :  { %p3279_p4 = scmp.ne.s32.totalorder %s4070_s3, %s3278_s14  ;;  %p3282_p5 = scmp.lt.u32.totalorder %s3278_s14, %s4070_s3 }
  0x4d   :  { %p3284_p6 = pnand %p3282_p5, %p3279_p4 }
  0x4f   :  { %3287 = shalt.err (!%p3284_p6)
}
  0x50   :  { %s3288_s1 = scalar_lea.vmem %s53_s27, 128  ;;  %p3293_p8 = scmp.lt.s32.totalorder %s53_s27, %s53_s27 }
  0x51   :  { %p3289_p7 = scmp.ne.s32.totalorder %s53_s27, %s3288_s1  ;;  %p3294_p9 = scmp.lt.s32.totalorder %s3288_s1, %s3288_s1 }
  0x53   :  { %p3295_p10 = por %p3294_p9, %p3293_p8 }
  0x55   :  { %p3296_p11 = pnand %p3295_p10, %p3289_p7 }
  0x57   :  { %3299 = shalt.err (!%p3296_p11)
}
  0x58   :  { %58 = dma.hbm_to_vmem [thread:$0]  %s4070_s3, 128, %s53_s27, [#allocation6], %s3380_s7, %s3380_s7, %s3381_s18  }
  0x59   :  { %s3300_s22 = scalar_lea.hbm %s4072_s5, 128 }
  0x5a   :  { %p3301_p12 = scmp.ne.s32.totalorder %s4072_s5, %s3300_s22  ;;  %p3304_p13 = scmp.lt.u32.totalorder %s3300_s22, %s4072_s5 }
  0x5c   :  { %p3306_p0 = pnand %p3304_p13, %p3301_p12 }
  0x5e   :  { %3309 = shalt.err (!%p3306_p0)
}
  0x5f   :  { %s3310_s28 = scalar_lea.vmem %s3520_s4, 128  ;;  %p3315_p2 = scmp.lt.s32.totalorder %s3520_s4, %s3520_s4 }
  0x60   :  { %p3311_p1 = scmp.ne.s32.totalorder %s3520_s4, %s3310_s28  ;;  %p3316_p3 = scmp.lt.s32.totalorder %s3310_s28, %s3310_s28 }
  0x62   :  { %p3317_p4 = por %p3316_p3, %p3315_p2 }
  0x64   :  { %p3318_p5 = pnand %p3317_p4, %p3311_p1 }
  0x66   :  { %3321 = shalt.err (!%p3318_p5)
}
  0x67   :  { %80 = dma.hbm_to_vmem [thread:$0]  %s4072_s5, 128, %s3520_s4, [#allocation9], %s3380_s7, %s3380_s7, %s3381_s18  }
  0x68   :  { %s3384_s30 = smov [#allocation13]   ;;  %s3322_s2 = scalar_lea.hbm %s4076_s9, 256 }
  0x69   :  { %s100_s14 = sshll.u32 %s3384_s30, 4  ;;  %p3323_p6 = scmp.ne.s32.totalorder %s4076_s9, %s3322_s2  ;;  %s101_s14 = int_to_ptr.vmem [resolvable:$true] %s100_s14 }
  0x6a   :  { %p3326_p7 = scmp.lt.u32.totalorder %s3322_s2, %s4076_s9 }
  0x6c   :  { %p3328_p8 = pnand %p3326_p7, %p3323_p6 }
  0x6e   :  { %3331 = shalt.err (!%p3328_p8)
}
  0x6f   :  { %s3332_s19 = scalar_lea.vmem %s101_s14, 256  ;;  %p3337_p10 = scmp.lt.s32.totalorder %s101_s14, %s101_s14 }
  0x70   :  { %p3333_p9 = scmp.ne.s32.totalorder %s101_s14, %s3332_s19  ;;  %p3338_p11 = scmp.lt.s32.totalorder %s3332_s19, %s3332_s19 }
  0x72   :  { %p3339_p12 = por %p3338_p11, %p3337_p10 }
  0x74   :  { %p3340_p13 = pnand %p3339_p12, %p3333_p9 }
  0x76   :  { %3343 = shalt.err (!%p3340_p13)
}
  0x77   :  { %106 = dma.hbm_to_vmem [thread:$0]  %s4076_s9, 256, %s101_s14, [#allocation12], %s3380_s7, %s3380_s7, %s3381_s18  }
  0x78   :  { %3366 = dma.done.wait [#allocation3], 128  }
  0x79   :  { %3367 = vsyncadd [#allocation3], 4294967168 }
  0x7a   :  { %3368 = dma.done.wait [#allocation6], 144  }
  0x7b   :  { %3369 = vsyncadd [#allocation6], 4294967152 }
  0x7c   :  { %3370 = dma.done.wait [#allocation9], 144  }
  0x7d   :  { %3371 = vsyncadd [#allocation9], 4294967152 }
  0x7e   :  { %3372 = dma.done.wait [#allocation12], 272  }
  0x7f   :  { %3373 = vsyncadd [#allocation12], 4294967024  ;;  %v3385_v0 = vmov 0.0   ;;  %vm3386_vm0 = vmmov 0   ;;  %v2915_v1 = vld [vmem:[#allocation2] sm:$0xff]   ;;  %v3586_v3 = vld [vmem:[%s4067_s0 + $0x8] sm:$0xff] }
  0x80   :  { %2713 = vmatprep.subr.bf16.mxu0 %v3385_v0  ;;  %2715 = vmatprep.mubr.msk.bf16.mxu0 %vm3386_vm0, %v3385_v0  ;;  %v3581_v2 = vld [vmem:[%s4067_s0] sm:$0xff]  ;;  %vm153_vm1 = vcmask 130048   ;;  %v2574_v5 = vld [vmem:[#allocation5] ss:$0 sm:$0xff]  ;;  %s3387_s0 = smov 112   ;;  %vm298_vm2 = vcmask 64512  }
  0x81   :  { %2719 = vmatprep.subr.bf16.mxu1 %v3385_v0  ;;  %2721 = vmatprep.mubr.msk.bf16.mxu1 %vm3386_vm0, %v3385_v0  ;;  %v137_v4 = vpack.c.bf16 %v3586_v3, %v3581_v2  ;;  %s3388_s23 = smov 96   ;;  %vm328_vm3 = vcmask 1043456   ;;  %v2916_v50 = vld [vmem:[#allocation7] sm:$0xff]   ;;  %v3625_v60 = vld [vmem:[%s4073_s6] sm:$0xff]   ;;  %v2917_v62 = vld [vmem:[#allocation10] sm:$0xff]   ;;  %v3389_v63 = vmov 0  }
  0x82   :  { %2714 = vmatpush3.bf16.msra.mxu0 %v2915_v1  ;;  %v3632_v61 = vld [vmem:[%s4073_s6 + $0x8] sm:$0xff]   ;;  %v2581_v1 = vld [vmem:[#allocation8] ss:$0 sm:$0xff]  ;;  %s3390_s6 = smov 32   ;;  %vm663_vm4 = vcmask 1041409   ;;  %vm558_vm5 = vcmask 261120  }
  0x83   :  { %2725 = vmatprep.subr.bf16.mxu0 %v3385_v0  ;;  %vm1466_vm6 = vcmask 1040384   ;;  %vm1469_vm7 = vcmask 1041408   ;;  %vm1472_vm8 = vcmask 1042432   ;;  %vm1477_vm9 = vcmask 1044480   ;;  %s3391_s1 = smov [#allocation14]  }
  0x84   :  { %vm1480_vm10 = vcmask 1045504   ;;  %vm1483_vm11 = vcmask 1046528   ;;  %s2562_s20 = sshll.u32 %s3391_s1, 4  ;;  %vm2554_vm12 = vcmask 25600   ;;  %s2563_s20 = int_to_ptr.vmem [resolvable:$true] %s2562_s20 }
  0x85   :  { %2716 = vmatmul.mubr.msk.bf16.vlgmr.msra.gmra.mrb[0].mxu0 %vm153_vm1, %v137_v4  ;;  %s3344_s17 = scalar_lea.vmem %s2563_s20, 32  ;;  %p3349_p1 = scmp.lt.s32.totalorder %s2563_s20, %s2563_s20 }
  0x86   :  { %2727 = vmatprep.mubr.msk.bf16.mxu0 %vm3386_vm0, %v3385_v0  ;;  %p3345_p0 = scmp.ne.s32.totalorder %s2563_s20, %s3344_s17  ;;  %p3350_p2 = scmp.lt.s32.totalorder %s3344_s17, %s3344_s17 }
  0x88   :  { %p3351_p3 = por %p3350_p2, %p3349_p1 }
  0x8a   :  { %p3352_p4 = pnand %p3351_p3, %p3345_p0 }
 0x158   :  { %v191_v6 = vpop.f32.mrb[0].mxu0 }
 0x159   :  { %v192_v7 = vadd.f32 %v2574_v5, %v191_v6  ;;  %v2717_v8 = vpop.f32.mrb[1].mxu0 }
 0x15a   :  { %v194_v9 = vpop.f32.mrb[2].mxu0 }
 0x15b   :  { %v198_v10 = vpack.c.bf16 %v192_v7, %v192_v7  ;;  %v195_v11 = vadd.f32 %v2574_v5, %v194_v9  ;;  %v2718_v12 = vpop.f32.mrb[3].mxu0 }
 0x15d   :  { %201 = vrot.lane.b32.xlu0 %v198_v10, %s3387_s0  ;;  %v199_v13 = vpack.c.bf16 %v195_v11, %v195_v11 }
 0x161   :  { %250 = vrot.lane.b32.xlu0 %v199_v13, %s3387_s0 }
 0x1cf   :  { %v202_v14 = vpop.permute.xlu0 %201 }
 0x1d0   :  { %v207_v15 = vsel %vm153_vm1, %v202_v14, 0 }
 0x1d1   :  { %2720 = vmatpush3.bf16.xpose.msra.mxu1 %v207_v15 }
 0x1d2   :  { %2731 = vmatprep.subr.bf16.mxu1 %v3385_v0 }
 0x1d3   :  { %v251_v16 = vpop.permute.xlu0 %250 }
 0x1d4   :  { %v256_v17 = vsel %vm153_vm1, %v251_v16, 0 }
 0x1d5   :  { %2726 = vmatpush3.bf16.xpose.msra.mxu0 %v256_v17 }
 0x1d6   :  { %2737 = vmatprep.subr.bf16.mxu0 %v3385_v0 }
 0x1d8   :  { %2722 = vmatmul.mubr.msk.bf16.vlgmr.msra.gmra.mrb[0].mxu1 %vm153_vm1, %v198_v10 }
 0x1d9   :  { %2733 = vmatprep.mubr.msk.bf16.mxu1 %vm3386_vm0, %v3385_v0 }
 0x1dc   :  { %2728 = vmatmul.mubr.msk.bf16.vlgmr.msra.gmra.mrb[4].mxu0 %vm153_vm1, %v199_v13 }
 0x1dd   :  { %2739 = vmatprep.mubr.msk.bf16.mxu0 %vm3386_vm0, %v3385_v0 }
 0x2ab   :  { %v243_v18 = vpop.f32.mrb[0].mxu1 }
 0x2ac   :  { %v2723_v19 = vpop.f32.mrb[1].mxu1  ;;  %v299_v20 = vsel %vm298_vm2, %v243_v18, -inf }
 0x2ad   :  { %300 = vmax.xlane.f32.xlu1 %v299_v20  ;;  %v246_v21 = vpop.f32.mrb[2].mxu1 }
 0x2ae   :  { %v2724_v22 = vpop.f32.mrb[3].mxu1 }
 0x2af   :  { %v292_v23 = vpop.f32.mrb[4].mxu0 }
 0x2b0   :  { %v2729_v24 = vpop.f32.mrb[5].mxu0  ;;  %v302_v25 = vsel %vm298_vm2, %v292_v23, -inf }
 0x2b1   :  { %303 = vmax.xlane.f32.xlu1 %v302_v25  ;;  %v295_v26 = vpop.f32.mrb[6].mxu0 }
 0x2b2   :  { %v2730_v27 = vpop.f32.mrb[7].mxu0 }
 0x2c2   :  { %323 = vrot.lane.b32.xlu1 %v198_v10, %s3388_s23 }
 0x33a   :  { %v301_v28 = vpop.xlane.xlu1 %300 }
 0x33b   :  { %v305_v29 = vsub.f32 %v243_v18, %v301_v28 }
 0x33d   :  { %v307_v30 = vmul.f32 1.442695, %v305_v29 }
 0x33e   :  { %v304_v31 = vpop.xlane.xlu1 %303 }
 0x33f   :  { %2926 = vpow2.f32 %v307_v30  ;;  %v306_v32 = vsub.f32 %v292_v23, %v304_v31 }
 0x341   :  { %v309_v33 = vmul.f32 1.442695, %v306_v32 }
 0x342   :  { %v324_v34 = vpop.permute.xlu1 %323 }
 0x343   :  { %2928 = vpow2.f32 %v309_v33  ;;  %v330_v35 = vsel %vm328_vm3, %v324_v34, 0 }
 0x344   :  { %2732 = vmatpush3.bf16.msra.mxu1 %v330_v35 }
 0x345   :  { %2743 = vmatprep.subr.bf16.mxu1 %v3385_v0 }
 0x349   :  { %v2927_v36 = vpop.eup %2926 }
 0x34a   :  { %v311_v37 = vsel %vm298_vm2, %v2927_v36, 0.0 }
 0x34b   :  { %312 = vadd.xlane.f32.xlu0 %v311_v37 }
 0x34d   :  { %v2929_v38 = vpop.eup %2928 }
 0x34e   :  { %v314_v39 = vsel %vm298_vm2, %v2929_v38, 0.0 }
 0x34f   :  { %315 = vadd.xlane.f32.xlu1 %v314_v39 }
 0x360   :  { %372 = vrot.lane.b32.xlu1 %v199_v13, %s3388_s23 }
 0x3d8   :  { %v313_v40 = vpop.xlane.xlu0 %312 }
 0x3d9   :  { %2930 = vrcp.f32 %v313_v40 }
 0x3dc   :  { %v316_v41 = vpop.xlane.xlu1 %315 }
 0x3dd   :  { %2932 = vrcp.f32 %v316_v41 }
 0x3e0   :  { %v373_v42 = vpop.permute.xlu1 %372 }
 0x3e1   :  { %v378_v43 = vsel %vm328_vm3, %v373_v42, 0 }
 0x3e2   :  { %2738 = vmatpush3.bf16.msra.mxu0 %v378_v43 }
 0x3e3   :  { %v2931_v44 = vpop.eup %2930  ;;  %2749 = vmatprep.subr.bf16.mxu0 %v3385_v0 }
 0x3e4   :  { %v319_v45 = vmul.f32 %v2931_v44, %v2927_v36 }
 0x3e6   :  { %v321_v46 = vpack.c.bf16 %v319_v45, %v319_v45 }
 0x3e7   :  { %v2933_v47 = vpop.eup %2932 }
 0x3e8   :  { %2734 = vmatmul.mubr.msk.bf16.vlgmr.msra.gmra.mrb[4].mxu1 %vm298_vm2, %v321_v46  ;;  %v320_v48 = vmul.f32 %v2933_v47, %v2929_v38 }
 0x3e9   :  { %2745 = vmatprep.mubr.msk.bf16.mxu1 %vm3386_vm0, %v3385_v0  ;;  %2744 = vmatpush3.bf16.msra.mxu1 %v2916_v50 }
 0x3ea   :  { %v322_v49 = vpack.c.bf16 %v320_v48, %v320_v48  ;;  %2755 = vmatprep.subr.bf16.mxu1 %v3385_v0 }
 0x3ec   :  { %2740 = vmatmul.mubr.msk.bf16.vlgmr.msra.gmra.mrb[8].mxu0 %vm298_vm2, %v322_v49 }
 0x3ed   :  { %2751 = vmatprep.mubr.msk.bf16.mxu0 %vm3386_vm0, %v3385_v0  ;;  %2750 = vmatpush3.bf16.msra.mxu0 %v2917_v62 }
 0x3ee   :  { %2763 = vmatprep.subr.bf16.mxu0 %v3385_v0 }
 0x4bb   :  { %v366_v51 = vpop.f32.mrb[4].mxu1 }
 0x4bc   :  { %v2735_v52 = vpop.f32.mrb[5].mxu1 }
 0x4bd   :  { %v369_v53 = vpop.f32.mrb[6].mxu1 }
 0x4be   :  { %v2736_v54 = vpop.f32.mrb[7].mxu1 }
 0x4bf   :  { %v414_v55 = vpop.f32.mrb[8].mxu0 }
 0x4c0   :  { %v420_v56 = vpack.c.bf16 %v414_v55, %v366_v51  ;;  %v2741_v57 = vpop.f32.mrb[9].mxu0 }
 0x4c1   :  { %v417_v58 = vpop.f32.mrb[10].mxu0 }
 0x4c2   :  { %v2742_v59 = vpop.f32.mrb[11].mxu0  ;;  %2746 = vmatmul.mubr.msk.bf16.vlgmr.msra.gmra.mrb[8].mxu1 %vm153_vm1, %v420_v56 }
 0x4c3   :  { %2759 = vmatprep.mubr.msk.bf16.mxu1 %vm3386_vm0, %v3385_v0  ;;  %2756 = vmatpush3.bf16.msra.mxu1 %v3625_v60 }
 0x4c4   :  { %2757 = vmatprep.subr.bf16.mxu1 %v3385_v0 }
 0x4c7   :  { %2758 = vmatpush3.bf16.msra.mxu1 %v3632_v61 }
 0x4c8   :  { %2771 = vmatprep.subr.bf16.mxu1 %v3385_v0 }
 0x4ca   :  { %2760 = vmatmul.mubr.bf16.vlgmr.msra.gmra.mrb[12].mxu1 %v3389_v63 }
 0x4cb   :  { %2772 = vmatpush3.bf16.msra.mxu1 %v3625_v60  ;;  %2775 = vmatprep.mubr.msk.bf16.mxu1 %vm3386_vm0, %v3385_v0 }
 0x4cc   :  { %2773 = vmatprep.subr.bf16.mxu1 %v3385_v0 }
 0x4cf   :  { %2774 = vmatpush3.bf16.msra.mxu1 %v3632_v61 }
 0x4d0   :  { %2787 = vmatprep.subr.bf16.mxu1 %v3385_v0 }
 0x595   :  { %v473_v4 = vpop.f32.mrb[8].mxu1 }
 0x596   :  { %v474_v5 = vadd.f32 %v2581_v1, %v473_v4  ;;  %v2747_v6 = vpop.f32.mrb[9].mxu1 }
 0x597   :  { %v476_v7 = vpop.f32.mrb[10].mxu1 }
 0x598   :  { %v477_v8 = vadd.f32 %v2581_v1, %v476_v7  ;;  %v2748_v9 = vpop.f32.mrb[11].mxu1  ;;  %v480_v10 = vadd.f32 %v474_v5, %v3581_v2 }
 0x59a   :  { %v481_v11 = vadd.f32 %v477_v8, %v3586_v3  ;;  %v2584_v3 = vld [vmem:[#allocation11] ss:$0 sm:$0xff] }
 0x59c   :  { %v489_v12 = vpack.c.bf16 %v481_v11, %v480_v10 }
 0x59d   :  { %v596_v13 = vpop.f32.mrb[12].mxu1 }
 0x59e   :  { %2752 = vmatmul.mubr.msk.bf16.vlgmr.msra.gmra.mrb[12].mxu0 %vm153_vm1, %v489_v12  ;;  %v2761_v14 = vpop.f32.mrb[13].mxu1  ;;  %v603_v17 = vrot.slane %v596_v13, 1 }
 0x59f   :  { %2764 = vmatpush3.bf16.msra.mxu0 %v3625_v60  ;;  %2767 = vmatprep.mubr.msk.bf16.mxu0 %vm3386_vm0, %v3385_v0  ;;  %v599_v15 = vpop.f32.mrb[14].mxu1 }
 0x5a0   :  { %2765 = vmatprep.subr.bf16.mxu0 %v3385_v0  ;;  %v2762_v2 = vpop.f32.mrb[15].mxu1 }
 0x5a3   :  { %2766 = vmatpush3.bf16.msra.mxu0 %v3632_v61 }
 0x5a4   :  { %2779 = vmatprep.subr.bf16.mxu0 %v3385_v0 }
 0x671   :  { %v539_v16 = vpop.f32.mrb[12].mxu0 }
 0x672   :  { %v2753_v18 = vpop.f32.mrb[13].mxu0  ;;  %v3655_v22 = vadd.f32 %v2584_v3, %v539_v16 }
 0x673   :  { %v542_v19 = vpop.f32.mrb[14].mxu0 }
 0x674   :  { %v3653_v20 = vadd.f32 %v2584_v3, %v542_v19  ;;  %v2754_v21 = vpop.f32.mrb[15].mxu0  ;;  %v606_v24 = vadd.f32 %v596_v13, %v3655_v22 }
 0x676   :  { %v607_v23 = vadd.f32 %v603_v17, %v3653_v20  ;;  %v2589_v28 = vmul.f32 -1.442695, %v606_v24 }
 0x678   :  { %2934 = vtanh.f32 %v607_v23  ;;  %v2590_v27 = vmul.f32 -1.442695, %v607_v23 }
 0x679   :  { %2936 = vtanh.f32 %v606_v24 }
 0x67a   :  { %2938 = vpow2.f32 %v2590_v27 }
 0x67b   :  { %2940 = vpow2.f32 %v2589_v28 }
 0x682   :  { %v2935_v25 = vpop.eup %2934 }
 0x683   :  { %628 = vrot.lane.b32.xlu1 %v2935_v25, %s3380_s7  ;;  %v2937_v26 = vpop.eup %2936 }
 0x684   :  { %v2939_v29 = vpop.eup %2938 }
 0x685   :  { %v615_v30 = vadd.f32 1.0, %v2939_v29  ;;  %v2941_v31 = vpop.eup %2940 }
 0x686   :  { %v614_v32 = vadd.f32 1.0, %v2941_v31 }
 0x687   :  { %626 = vrot.lane.b32.xlu1 %v2937_v26, %s3380_s7  ;;  %2942 = vrcp.f32 %v615_v30 }
 0x688   :  { %2944 = vrcp.f32 %v614_v32 }
 0x691   :  { %v2943_v33 = vpop.eup %2942 }
 0x692   :  { %v2945_v36 = vpop.eup %2944  ;;  %v623_v39 = vmul.f32 0.0, %v2943_v33 }
 0x693   :  { %v622_v42 = vmul.f32 0.0, %v2945_v36 }
 0x6f5   :  { %v629_v34 = vpop.permute.xlu1 %628 }
 0x6f6   :  { %v633_v35 = vmul.f32 %v2943_v33, %v629_v34 }
 0x6f8   :  { %638 = vrot.lane.b32.xlu0 %v633_v35, %s3390_s6 }
 0x6f9   :  { %v627_v37 = vpop.permute.xlu1 %626 }
 0x6fa   :  { %v632_v38 = vmul.f32 %v2945_v36, %v627_v37 }
 0x6fc   :  { %636 = vrot.lane.b32.xlu1 %v632_v38, %s3390_s6 }
 0x76a   :  { %v639_v40 = vpop.permute.xlu0 %638 }
 0x76b   :  { %v3663_v41 = vadd.f32 %v639_v40, %v623_v39 }
 0x76d   :  { %2946 = vtanh.f32 %v3663_v41  ;;  %v734_v21 = vrot.slane %v3663_v41, 7 }
 0x76e   :  { %v637_v43 = vpop.permute.xlu1 %636 }
 0x76f   :  { %v3666_v44 = vadd.f32 %v637_v43, %v622_v42 }
 0x771   :  { %2948 = vtanh.f32 %v3666_v44  ;;  %v733_v24 = vrot.slane %v3666_v44, 7 }
 0x777   :  { %v2947_v45 = vpop.eup %2946 }
 0x778   :  { %650 = vrot.lane.b32.xlu1 %v2947_v45, %s3380_s7 }
 0x77b   :  { %v2949_v46 = vpop.eup %2948 }
 0x77c   :  { %648 = vrot.lane.b32.xlu1 %v2949_v46, %s3380_s7 }
 0x7ea   :  { %v651_v47 = vpop.permute.xlu1 %650 }
 0x7eb   :  { %v3671_v48 = vmul.f32 %v2943_v33, %v651_v47 }
 0x7ed   :  { %v657_v49 = vpack.c.bf16 %v3671_v48, %v3671_v48 }
 0x7ee   :  { %v649_v50 = vpop.permute.xlu1 %648 }
 0x7ef   :  { %v661_v51 = vunpack.c.l.b16 %v657_v49  ;;  %v3675_v52 = vmul.f32 %v2945_v36, %v649_v50 }
 0x7f1   :  { %v656_v53 = vpack.c.bf16 %v3675_v52, %v3675_v52  ;;  %v662_v54 = vrot.slane %v661_v51, 7 }
 0x7f3   :  { %v660_v55 = vunpack.c.l.b16 %v656_v53 }
 0x7f5   :  { %v664_v56 = vsel %vm663_vm4, %v662_v54, %v660_v55 }
 0x7f6   :  { %v665_v57 = vpack.c.b16 %v664_v56, %v664_v56 }
 0x7f8   :  { %666 = vrot.lane.b32.xlu1 %v665_v57, %s3390_s6 }
 0x86a   :  { %v667_v58 = vpop.permute.xlu1 %666 }
 0x86b   :  { %2768 = vmatmul.mubr.msk.bf16.vlgmr.msra.gmra.mrb[16].mxu0 %vm558_vm5, %v667_v58 }
 0x86c   :  { %2780 = vmatpush3.bf16.msra.mxu0 %v3625_v60  ;;  %2783 = vmatprep.mubr.msk.bf16.mxu0 %vm3386_vm0, %v3385_v0 }
 0x86d   :  { %2781 = vmatprep.subr.bf16.mxu0 %v3385_v0 }
 0x870   :  { %2782 = vmatpush3.bf16.msra.mxu0 %v3632_v61 }
 0x871   :  { %2795 = vmatprep.subr.bf16.mxu0 %v3385_v0 }
 0x93e   :  { %v705_v59 = vpop.f32.mrb[16].mxu0 }
 0x93f   :  { %v712_v62 = vrot.slane %v705_v59, 7  ;;  %v716_v1 = vadd.f32 %v705_v59, %v3653_v20  ;;  %v2769_v4 = vpop.f32.mrb[17].mxu0 }
 0x940   :  { %v708_v5 = vpop.f32.mrb[18].mxu0 }
 0x941   :  { %v715_v6 = vadd.f32 %v712_v62, %v3655_v22  ;;  %2950 = vtanh.f32 %v716_v1  ;;  %v2770_v7 = vpop.f32.mrb[19].mxu0  ;;  %v2593_v10 = vmul.f32 -1.442695, %v716_v1 }
 0x943   :  { %2952 = vtanh.f32 %v715_v6  ;;  %v2592_v11 = vmul.f32 -1.442695, %v715_v6 }
 0x944   :  { %2954 = vpow2.f32 %v2593_v10 }
 0x945   :  { %2956 = vpow2.f32 %v2592_v11 }
 0x94b   :  { %v2951_v8 = vpop.eup %2950 }
 0x94c   :  { %743 = vrot.lane.b32.xlu0 %v2951_v8, %s3380_s7 }
 0x94d   :  { %v2953_v9 = vpop.eup %2952 }
 0x94e   :  { %741 = vrot.lane.b32.xlu1 %v2953_v9, %s3380_s7  ;;  %v2955_v12 = vpop.eup %2954 }
 0x94f   :  { %v2957_v13 = vpop.eup %2956  ;;  %v724_v14 = vadd.f32 1.0, %v2955_v12 }
 0x950   :  { %v723_v15 = vadd.f32 1.0, %v2957_v13 }
 0x951   :  { %2958 = vrcp.f32 %v724_v14 }
 0x952   :  { %2960 = vrcp.f32 %v723_v15 }
 0x95b   :  { %v2959_v2 = vpop.eup %2958 }
 0x95c   :  { %v2961_v17 = vpop.eup %2960  ;;  %v738_v23 = vmul.f32 %v2959_v2, %v734_v21 }
 0x95d   :  { %v737_v27 = vmul.f32 %v2961_v17, %v733_v24 }
 0x9be   :  { %v744_v16 = vpop.permute.xlu0 %743 }
 0x9bf   :  { %v748_v3 = vmul.f32 %v2959_v2, %v744_v16 }
 0x9c0   :  { %v742_v18 = vpop.permute.xlu1 %741 }
 0x9c1   :  { %753 = vrot.lane.b32.xlu0 %v748_v3, %s3390_s6  ;;  %v747_v19 = vmul.f32 %v2961_v17, %v742_v18 }
 0x9c3   :  { %751 = vrot.lane.b32.xlu1 %v747_v19, %s3390_s6 }
 0xa33   :  { %v754_v25 = vpop.permute.xlu0 %753 }
 0xa34   :  { %v3696_v26 = vadd.f32 %v754_v25, %v738_v23 }
 0xa35   :  { %v752_v28 = vpop.permute.xlu1 %751 }
 0xa36   :  { %2962 = vtanh.f32 %v3696_v26  ;;  %v757_v29 = vadd.f32 %v752_v28, %v737_v27  ;;  %v849_v11 = vrot.slane %v3696_v26, 7 }
 0xa38   :  { %2964 = vtanh.f32 %v757_v29  ;;  %v848_v10 = vrot.slane %v757_v29, 7 }
 0xa40   :  { %v2963_v30 = vpop.eup %2962 }
 0xa41   :  { %765 = vrot.lane.b32.xlu0 %v2963_v30, %s3380_s7 }
 0xa42   :  { %v2965_v31 = vpop.eup %2964 }
 0xa43   :  { %763 = vrot.lane.b32.xlu1 %v2965_v31, %s3380_s7 }
 0xab3   :  { %v766_v32 = vpop.permute.xlu0 %765 }
 0xab4   :  { %v3701_v33 = vmul.f32 %v2959_v2, %v766_v32 }
 0xab5   :  { %v764_v34 = vpop.permute.xlu1 %763 }
 0xab6   :  { %v3703_v35 = vmul.f32 %v2961_v17, %v764_v34  ;;  %v772_v36 = vpack.c.bf16 %v3701_v33, %v3701_v33  ;;  %v1468_v25 = vsel %vm1466_vm6, %v3671_v48, %v3701_v33 }
 0xab8   :  { %v771_v37 = vpack.c.bf16 %v3703_v35, %v3703_v35  ;;  %v776_v39 = vunpack.c.l.b16 %v772_v36  ;;  %v1467_v23 = vsel %vm1466_vm6, %v3675_v52, %v3703_v35 }
 0xaba   :  { %v775_v38 = vunpack.c.l.b16 %v771_v37 }
 0xabc   :  { %v777_v40 = vrot.slane %v775_v38, 1 }
 0xabe   :  { %v778_v41 = vsel %vm663_vm4, %v776_v39, %v777_v40 }
 0xabf   :  { %v779_v42 = vpack.c.b16 %v778_v41, %v778_v41 }
 0xac1   :  { %780 = vrot.lane.b32.xlu1 %v779_v42, %s3390_s6 }
 0xb33   :  { %v781_v43 = vpop.permute.xlu1 %780 }
 0xb34   :  { %2776 = vmatmul.mubr.msk.bf16.vlgmr.msra.gmra.mrb[16].mxu1 %vm558_vm5, %v781_v43 }
 0xb35   :  { %2788 = vmatpush3.bf16.msra.mxu1 %v3625_v60  ;;  %2791 = vmatprep.mubr.msk.bf16.mxu1 %vm3386_vm0, %v3385_v0 }
 0xb36   :  { %2789 = vmatprep.subr.bf16.mxu1 %v3385_v0 }
 0xb39   :  { %2790 = vmatpush3.bf16.msra.mxu1 %v3632_v61 }
 0xb3a   :  { %2803 = vmatprep.subr.bf16.mxu1 %v3385_v0 }
 0xc07   :  { %v819_v44 = vpop.f32.mrb[16].mxu1 }
 0xc08   :  { %v826_v45 = vrot.slane %v819_v44, 6  ;;  %v827_v46 = vrot.slane %v819_v44, 7  ;;  %v2777_v47 = vpop.f32.mrb[17].mxu1 }
 0xc09   :  { %v822_v49 = vpop.f32.mrb[18].mxu1 }
 0xc0a   :  { %v830_v50 = vadd.f32 %v826_v45, %v3655_v22  ;;  %v831_v51 = vadd.f32 %v827_v46, %v3653_v20  ;;  %v2778_v53 = vpop.f32.mrb[19].mxu1 }
 0xc0c   :  { %2966 = vtanh.f32 %v830_v50  ;;  %v2595_v56 = vmul.f32 -1.442695, %v830_v50  ;;  %v2596_v57 = vmul.f32 -1.442695, %v831_v51 }
 0xc0d   :  { %2968 = vtanh.f32 %v831_v51 }
 0xc0e   :  { %2970 = vpow2.f32 %v2595_v56 }
 0xc0f   :  { %2972 = vpow2.f32 %v2596_v57 }
 0xc16   :  { %v2967_v54 = vpop.eup %2966 }
 0xc17   :  { %v2969_v55 = vpop.eup %2968  ;;  %856 = vrot.lane.b32.xlu0 %v2967_v54, %s3380_s7 }
 0xc18   :  { %858 = vrot.lane.b32.xlu1 %v2969_v55, %s3380_s7  ;;  %v2971_v58 = vpop.eup %2970 }
 0xc19   :  { %v2973_v59 = vpop.eup %2972  ;;  %v838_v62 = vadd.f32 1.0, %v2971_v58 }
 0xc1a   :  { %v839_v1 = vadd.f32 1.0, %v2973_v59 }
 0xc1b   :  { %2974 = vrcp.f32 %v838_v62 }
 0xc1c   :  { %2976 = vrcp.f32 %v839_v1 }
 0xc25   :  { %v2975_v4 = vpop.eup %2974 }
 0xc26   :  { %v2977_v6 = vpop.eup %2976  ;;  %v852_v12 = vmul.f32 %v2975_v4, %v848_v10 }
 0xc27   :  { %v853_v13 = vmul.f32 %v2977_v6, %v849_v11 }
 0xc89   :  { %v857_v5 = vpop.permute.xlu0 %856 }
 0xc8a   :  { %v859_v7 = vpop.permute.xlu1 %858  ;;  %v862_v8 = vmul.f32 %v2975_v4, %v857_v5 }
 0xc8b   :  { %v863_v9 = vmul.f32 %v2977_v6, %v859_v7 }
 0xc8c   :  { %866 = vrot.lane.b32.xlu0 %v862_v8, %s3390_s6 }
 0xc8d   :  { %868 = vrot.lane.b32.xlu1 %v863_v9, %s3390_s6 }
 0xcfe   :  { %v867_v14 = vpop.permute.xlu0 %866 }
 0xcff   :  { %v869_v15 = vpop.permute.xlu1 %868  ;;  %v3725_v2 = vadd.f32 %v867_v14, %v852_v12 }
 0xd00   :  { %v3727_v16 = vadd.f32 %v869_v15, %v853_v13 }
 0xd01   :  { %2978 = vtanh.f32 %v3725_v2  ;;  %v964_v59 = vrot.slane %v3725_v2, 7 }
 0xd02   :  { %2980 = vtanh.f32 %v3727_v16  ;;  %v965_v62 = vrot.slane %v3727_v16, 7 }
 0xd0b   :  { %v2979_v3 = vpop.eup %2978 }
 0xd0c   :  { %v2981_v17 = vpop.eup %2980  ;;  %878 = vrot.lane.b32.xlu0 %v2979_v3, %s3380_s7 }
 0xd0d   :  { %880 = vrot.lane.b32.xlu1 %v2981_v17, %s3380_s7 }
 0xd7e   :  { %v879_v18 = vpop.permute.xlu0 %878 }
 0xd7f   :  { %v881_v19 = vpop.permute.xlu1 %880  ;;  %v884_v21 = vmul.f32 %v2975_v4, %v879_v18 }
 0xd80   :  { %v885_v24 = vmul.f32 %v2977_v6, %v881_v19 }
 0xd81   :  { %v886_v26 = vpack.c.bf16 %v884_v21, %v884_v21  ;;  %v3737_v27 = vsel %vm1469_vm7, %v1467_v23, %v884_v21 }
 0xd82   :  { %v887_v28 = vpack.c.bf16 %v885_v24, %v885_v24  ;;  %v3739_v29 = vsel %vm1469_vm7, %v1468_v25, %v885_v24 }
 0xd83   :  { %v890_v30 = vunpack.c.l.b16 %v886_v26 }
 0xd84   :  { %v891_v31 = vunpack.c.l.b16 %v887_v28 }
 0xd85   :  { %v892_v32 = vrot.slane %v890_v30, 2 }
 0xd86   :  { %v893_v34 = vrot.slane %v891_v31, 1 }
 0xd88   :  { %v894_v36 = vsel %vm663_vm4, %v893_v34, %v892_v32 }
 0xd89   :  { %v895_v37 = vpack.c.b16 %v894_v36, %v894_v36 }
 0xd8b   :  { %896 = vrot.lane.b32.xlu0 %v895_v37, %s3390_s6 }
 0xdfd   :  { %v897_v52 = vpop.permute.xlu0 %896 }
 0xdfe   :  { %2784 = vmatmul.mubr.msk.bf16.vlgmr.msra.gmra.mrb[20].mxu0 %vm558_vm5, %v897_v52 }
 0xdff   :  { %2796 = vmatpush3.bf16.msra.mxu0 %v3625_v60  ;;  %2799 = vmatprep.mubr.msk.bf16.mxu0 %vm3386_vm0, %v3385_v0 }
 0xe00   :  { %2797 = vmatprep.subr.bf16.mxu0 %v3385_v0 }
 0xe03   :  { %2798 = vmatpush3.bf16.msra.mxu0 %v3632_v61 }
 0xe04   :  { %2811 = vmatprep.subr.bf16.mxu0 %v3385_v0 }
 0xed1   :  { %v935_v48 = vpop.f32.mrb[20].mxu0 }
 0xed2   :  { %v942_v33 = vrot.slane %v935_v48, 5  ;;  %v943_v35 = vrot.slane %v935_v48, 6  ;;  %v2785_v38 = vpop.f32.mrb[21].mxu0 }
 0xed3   :  { %v938_v39 = vpop.f32.mrb[22].mxu0 }
 0xed4   :  { %v946_v40 = vadd.f32 %v942_v33, %v3655_v22  ;;  %v947_v41 = vadd.f32 %v943_v35, %v3653_v20  ;;  %v2786_v42 = vpop.f32.mrb[23].mxu0 }
 0xed6   :  { %2982 = vtanh.f32 %v946_v40  ;;  %v2598_v45 = vmul.f32 -1.442695, %v946_v40  ;;  %v2599_v46 = vmul.f32 -1.442695, %v947_v41 }
 0xed7   :  { %2984 = vtanh.f32 %v947_v41 }
 0xed8   :  { %2986 = vpow2.f32 %v2598_v45 }
 0xed9   :  { %2988 = vpow2.f32 %v2599_v46 }
 0xee0   :  { %v2983_v43 = vpop.eup %2982 }
 0xee1   :  { %v2985_v44 = vpop.eup %2984  ;;  %972 = vrot.lane.b32.xlu1 %v2983_v43, %s3380_s7 }
 0xee2   :  { %974 = vrot.lane.b32.xlu0 %v2985_v44, %s3380_s7  ;;  %v2987_v47 = vpop.eup %2986 }
 0xee3   :  { %v2989_v49 = vpop.eup %2988  ;;  %v954_v50 = vadd.f32 1.0, %v2987_v47 }
 0xee4   :  { %v955_v51 = vadd.f32 1.0, %v2989_v49 }
 0xee5   :  { %2990 = vrcp.f32 %v954_v50 }
 0xee6   :  { %2992 = vrcp.f32 %v955_v51 }
 0xeef   :  { %v2991_v53 = vpop.eup %2990 }
 0xef0   :  { %v2993_v55 = vpop.eup %2992  ;;  %v968_v1 = vmul.f32 %v2991_v53, %v964_v59 }
 0xef1   :  { %v969_v4 = vmul.f32 %v2993_v55, %v965_v62 }
 0xf53   :  { %v973_v54 = vpop.permute.xlu1 %972 }
 0xf54   :  { %v975_v56 = vpop.permute.xlu0 %974  ;;  %v978_v57 = vmul.f32 %v2991_v53, %v973_v54 }
 0xf55   :  { %v979_v58 = vmul.f32 %v2993_v55, %v975_v56 }
 0xf56   :  { %982 = vrot.lane.b32.xlu1 %v978_v57, %s3390_s6 }
 0xf57   :  { %984 = vrot.lane.b32.xlu0 %v979_v58, %s3390_s6 }
 0xfc8   :  { %v983_v5 = vpop.permute.xlu1 %982 }
 0xfc9   :  { %v985_v6 = vpop.permute.xlu0 %984  ;;  %v3758_v7 = vadd.f32 %v983_v5, %v968_v1 }
 0xfca   :  { %v3760_v8 = vadd.f32 %v985_v6, %v969_v4 }
 0xfcb   :  { %2994 = vtanh.f32 %v3758_v7  ;;  %v1080_v46 = vrot.slane %v3758_v7, 7 }
 0xfcc   :  { %2996 = vtanh.f32 %v3760_v8  ;;  %v1081_v47 = vrot.slane %v3760_v8, 7 }
 0xfd5   :  { %v2995_v9 = vpop.eup %2994 }
 0xfd6   :  { %v2997_v10 = vpop.eup %2996  ;;  %994 = vrot.lane.b32.xlu1 %v2995_v9, %s3380_s7 }
 0xfd7   :  { %996 = vrot.lane.b32.xlu0 %v2997_v10, %s3380_s7 }
0x1048   :  { %v995_v11 = vpop.permute.xlu1 %994 }
0x1049   :  { %v997_v12 = vpop.permute.xlu0 %996  ;;  %v1000_v13 = vmul.f32 %v2991_v53, %v995_v11 }
0x104a   :  { %v1001_v14 = vmul.f32 %v2993_v55, %v997_v12 }
0x104b   :  { %v1002_v15 = vpack.c.bf16 %v1000_v13, %v1000_v13  ;;  %v3767_v2 = vsel %vm1472_vm8, %v3737_v27, %v1000_v13 }
0x104c   :  { %v1003_v16 = vpack.c.bf16 %v1001_v14, %v1001_v14  ;;  %v3770_v3 = vsel %vm1472_vm8, %v3739_v29, %v1001_v14 }
0x104d   :  { %v1006_v17 = vunpack.c.l.b16 %v1002_v15 }
0x104e   :  { %v1007_v18 = vunpack.c.l.b16 %v1003_v16 }
0x104f   :  { %v1008_v19 = vrot.slane %v1006_v17, 3 }
0x1050   :  { %v1009_v21 = vrot.slane %v1007_v18, 2 }
0x1052   :  { %v1010_v23 = vsel %vm663_vm4, %v1009_v21, %v1008_v19 }
0x1053   :  { %v1011_v24 = vpack.c.b16 %v1010_v23, %v1010_v23 }
0x1055   :  { %1012 = vrot.lane.b32.xlu1 %v1011_v24, %s3390_s6 }
0x10c7   :  { %v1013_v25 = vpop.permute.xlu1 %1012 }
0x10c8   :  { %2792 = vmatmul.mubr.msk.bf16.vlgmr.msra.gmra.mrb[20].mxu1 %vm558_vm5, %v1013_v25 }
0x10c9   :  { %2804 = vmatpush3.bf16.msra.mxu1 %v3625_v60  ;;  %2807 = vmatprep.mubr.msk.bf16.mxu1 %vm3386_vm0, %v3385_v0 }
0x10ca   :  { %2805 = vmatprep.subr.bf16.mxu1 %v3385_v0 }
0x10cd   :  { %2806 = vmatpush3.bf16.msra.mxu1 %v3632_v61 }
0x10ce   :  { %2819 = vmatprep.subr.bf16.mxu1 %v3385_v0 }
0x119b   :  { %v1051_v26 = vpop.f32.mrb[20].mxu1 }
0x119c   :  { %v1058_v27 = vrot.slane %v1051_v26, 4  ;;  %v1059_v28 = vrot.slane %v1051_v26, 5  ;;  %v2793_v29 = vpop.f32.mrb[21].mxu1 }
0x119d   :  { %v1054_v30 = vpop.f32.mrb[22].mxu1 }
0x119e   :  { %v1062_v31 = vadd.f32 %v1058_v27, %v3655_v22  ;;  %v1063_v32 = vadd.f32 %v1059_v28, %v3653_v20  ;;  %v2794_v34 = vpop.f32.mrb[23].mxu1 }
0x11a0   :  { %2998 = vtanh.f32 %v1062_v31  ;;  %v2601_v52 = vmul.f32 -1.442695, %v1062_v31  ;;  %v2602_v48 = vmul.f32 -1.442695, %v1063_v32 }
0x11a1   :  { %3000 = vtanh.f32 %v1063_v32 }
0x11a2   :  { %3002 = vpow2.f32 %v2601_v52 }
0x11a3   :  { %3004 = vpow2.f32 %v2602_v48 }
0x11aa   :  { %v2999_v36 = vpop.eup %2998 }
0x11ab   :  { %v3001_v37 = vpop.eup %3000  ;;  %1088 = vrot.lane.b32.xlu0 %v2999_v36, %s3380_s7 }
0x11ac   :  { %1090 = vrot.lane.b32.xlu1 %v3001_v37, %s3380_s7  ;;  %v3003_v33 = vpop.eup %3002 }
0x11ad   :  { %v3005_v35 = vpop.eup %3004  ;;  %v1070_v38 = vadd.f32 1.0, %v3003_v33 }
0x11ae   :  { %v1071_v39 = vadd.f32 1.0, %v3005_v35 }
0x11af   :  { %3006 = vrcp.f32 %v1070_v38 }
0x11b0   :  { %3008 = vrcp.f32 %v1071_v39 }
0x11b9   :  { %v3007_v40 = vpop.eup %3006 }
0x11ba   :  { %v3009_v42 = vpop.eup %3008  ;;  %v1084_v49 = vmul.f32 %v3007_v40, %v1080_v46 }
0x11bb   :  { %v1085_v50 = vmul.f32 %v3009_v42, %v1081_v47 }
0x121d   :  { %v1089_v41 = vpop.permute.xlu0 %1088 }
0x121e   :  { %v1091_v43 = vpop.permute.xlu1 %1090  ;;  %v1094_v44 = vmul.f32 %v3007_v40, %v1089_v41 }
0x121f   :  { %v1095_v45 = vmul.f32 %v3009_v42, %v1091_v43 }
0x1220   :  { %1098 = vrot.lane.b32.xlu0 %v1094_v44, %s3390_s6 }
0x1221   :  { %1100 = vrot.lane.b32.xlu1 %v1095_v45, %s3390_s6 }
0x1292   :  { %v1099_v51 = vpop.permute.xlu0 %1098 }
0x1293   :  { %v1101_v53 = vpop.permute.xlu1 %1100  ;;  %v3789_v54 = vadd.f32 %v1099_v51, %v1084_v49 }
0x1294   :  { %v3791_v55 = vadd.f32 %v1101_v53, %v1085_v50 }
0x1295   :  { %3010 = vtanh.f32 %v3789_v54  ;;  %v1196_v37 = vrot.slane %v3789_v54, 7 }
0x1296   :  { %3012 = vtanh.f32 %v3791_v55  ;;  %v1197_v52 = vrot.slane %v3791_v55, 7 }
0x129f   :  { %v3011_v56 = vpop.eup %3010 }
0x12a0   :  { %v3013_v57 = vpop.eup %3012  ;;  %1110 = vrot.lane.b32.xlu0 %v3011_v56, %s3380_s7 }
0x12a1   :  { %1112 = vrot.lane.b32.xlu1 %v3013_v57, %s3380_s7 }
0x1312   :  { %v1111_v58 = vpop.permute.xlu0 %1110 }
0x1313   :  { %v1113_v59 = vpop.permute.xlu1 %1112  ;;  %v1116_v62 = vmul.f32 %v3007_v40, %v1111_v58 }
0x1314   :  { %v1117_v1 = vmul.f32 %v3009_v42, %v1113_v59 }
0x1315   :  { %v1118_v4 = vpack.c.bf16 %v1116_v62, %v1116_v62  ;;  %v3799_v5 = vsel %vm328_vm3, %v3767_v2, %v1116_v62 }
0x1316   :  { %v1119_v6 = vpack.c.bf16 %v1117_v1, %v1117_v1  ;;  %v3803_v7 = vsel %vm328_vm3, %v3770_v3, %v1117_v1 }
0x1317   :  { %v1122_v8 = vunpack.c.l.b16 %v1118_v4 }
0x1318   :  { %v1123_v9 = vunpack.c.l.b16 %v1119_v6 }
0x1319   :  { %v1124_v10 = vrot.slane %v1122_v8, 4 }
0x131a   :  { %v1125_v11 = vrot.slane %v1123_v9, 3 }
0x131c   :  { %v1126_v12 = vsel %vm663_vm4, %v1125_v11, %v1124_v10 }
0x131d   :  { %v1127_v13 = vpack.c.b16 %v1126_v12, %v1126_v12 }
0x131f   :  { %1128 = vrot.lane.b32.xlu0 %v1127_v13, %s3390_s6 }
0x1391   :  { %v1129_v14 = vpop.permute.xlu0 %1128 }
0x1392   :  { %2800 = vmatmul.mubr.msk.bf16.vlgmr.msra.gmra.mrb[24].mxu0 %vm558_vm5, %v1129_v14 }
0x1393   :  { %2812 = vmatpush3.bf16.msra.mxu0 %v3625_v60  ;;  %2815 = vmatprep.mubr.msk.bf16.mxu0 %vm3386_vm0, %v3385_v0 }
0x1394   :  { %2813 = vmatprep.subr.bf16.mxu0 %v3385_v0 }
0x1397   :  { %2814 = vmatpush3.bf16.msra.mxu0 %v3632_v61 }
0x1398   :  { %2827 = vmatprep.subr.bf16.mxu0 %v3385_v0 }
0x1465   :  { %v1167_v15 = vpop.f32.mrb[24].mxu0 }
0x1466   :  { %v1174_v2 = vrot.slane %v1167_v15, 3  ;;  %v1175_v16 = vrot.slane %v1167_v15, 4  ;;  %v2801_v3 = vpop.f32.mrb[25].mxu0 }
0x1467   :  { %v1170_v17 = vpop.f32.mrb[26].mxu0 }
0x1468   :  { %v1178_v18 = vadd.f32 %v1174_v2, %v3655_v22  ;;  %v1179_v19 = vadd.f32 %v1175_v16, %v3653_v20  ;;  %v2802_v21 = vpop.f32.mrb[27].mxu0 }
0x146a   :  { %3014 = vtanh.f32 %v1178_v18  ;;  %v2604_v61 = vmul.f32 -1.442695, %v1178_v18  ;;  %v2605_v24 = vmul.f32 -1.442695, %v1179_v19 }
0x146b   :  { %3016 = vtanh.f32 %v1179_v19 }
0x146c   :  { %3018 = vpow2.f32 %v2604_v61 }
0x146d   :  { %3020 = vpow2.f32 %v2605_v24 }
0x1474   :  { %v3015_v60 = vpop.eup %3014 }
0x1475   :  { %v3017_v23 = vpop.eup %3016  ;;  %1204 = vrot.lane.b32.xlu1 %v3015_v60, %s3380_s7 }
0x1476   :  { %1206 = vrot.lane.b32.xlu0 %v3017_v23, %s3380_s7  ;;  %v3019_v25 = vpop.eup %3018 }
0x1477   :  { %v3021_v26 = vpop.eup %3020  ;;  %v1186_v27 = vadd.f32 1.0, %v3019_v25 }
0x1478   :  { %v1187_v28 = vadd.f32 1.0, %v3021_v26 }
0x1479   :  { %3022 = vrcp.f32 %v1186_v27 }
0x147a   :  { %3024 = vrcp.f32 %v1187_v28 }
0x1483   :  { %v3023_v29 = vpop.eup %3022 }
0x1484   :  { %v3025_v31 = vpop.eup %3024  ;;  %v1200_v48 = vmul.f32 %v3023_v29, %v1196_v37 }
0x1485   :  { %v1201_v33 = vmul.f32 %v3025_v31, %v1197_v52 }
0x14e7   :  { %v1205_v30 = vpop.permute.xlu1 %1204 }
0x14e8   :  { %v1207_v32 = vpop.permute.xlu0 %1206  ;;  %v1210_v34 = vmul.f32 %v3023_v29, %v1205_v30 }
0x14e9   :  { %v1211_v36 = vmul.f32 %v3025_v31, %v1207_v32 }
0x14ea   :  { %1214 = vrot.lane.b32.xlu1 %v1210_v34, %s3390_s6 }
0x14eb   :  { %1216 = vrot.lane.b32.xlu0 %v1211_v36, %s3390_s6 }
0x155c   :  { %v1215_v35 = vpop.permute.xlu1 %1214 }
0x155d   :  { %v1217_v38 = vpop.permute.xlu0 %1216  ;;  %v1220_v39 = vadd.f32 %v1215_v35, %v1200_v48 }
0x155e   :  { %v1221_v40 = vadd.f32 %v1217_v38, %v1201_v33 }
0x155f   :  { %3026 = vtanh.f32 %v1220_v39  ;;  %v1312_v23 = vrot.slane %v1220_v39, 7 }
0x1560   :  { %3028 = vtanh.f32 %v1221_v40  ;;  %v1313_v61 = vrot.slane %v1221_v40, 7 }
0x1569   :  { %v3027_v41 = vpop.eup %3026 }
0x156a   :  { %v3029_v42 = vpop.eup %3028  ;;  %1226 = vrot.lane.b32.xlu1 %v3027_v41, %s3380_s7 }
0x156b   :  { %1228 = vrot.lane.b32.xlu0 %v3029_v42, %s3380_s7 }
0x15dc   :  { %v1227_v43 = vpop.permute.xlu1 %1226 }
0x15dd   :  { %v1229_v44 = vpop.permute.xlu0 %1228  ;;  %v1232_v45 = vmul.f32 %v3023_v29, %v1227_v43 }
0x15de   :  { %v1233_v46 = vmul.f32 %v3025_v31, %v1229_v44 }
0x15df   :  { %v1234_v47 = vpack.c.bf16 %v1232_v45, %v1232_v45  ;;  %v3825_v49 = vsel %vm1477_vm9, %v3799_v5, %v1232_v45 }
0x15e0   :  { %v1235_v50 = vpack.c.bf16 %v1233_v46, %v1233_v46  ;;  %v3828_v51 = vsel %vm1477_vm9, %v3803_v7, %v1233_v46 }
0x15e1   :  { %v1238_v53 = vunpack.c.l.b16 %v1234_v47 }
0x15e2   :  { %v1239_v54 = vunpack.c.l.b16 %v1235_v50 }
0x15e3   :  { %v1240_v55 = vrot.slane %v1238_v53, 5 }
0x15e4   :  { %v1241_v56 = vrot.slane %v1239_v54, 4 }
0x15e6   :  { %v1242_v57 = vsel %vm663_vm4, %v1241_v56, %v1240_v55 }
0x15e7   :  { %v1243_v58 = vpack.c.b16 %v1242_v57, %v1242_v57 }
0x15e9   :  { %1244 = vrot.lane.b32.xlu1 %v1243_v58, %s3390_s6 }
0x165b   :  { %v1245_v59 = vpop.permute.xlu1 %1244 }
0x165c   :  { %2808 = vmatmul.mubr.msk.bf16.vlgmr.msra.gmra.mrb[24].mxu1 %vm558_vm5, %v1245_v59 }
0x165d   :  { %2823 = vmatprep.mubr.msk.bf16.mxu1 %vm3386_vm0, %v3385_v0 }
0x172f   :  { %v1283_v62 = vpop.f32.mrb[24].mxu1 }
0x1730   :  { %v1290_v1 = vrot.slane %v1283_v62, 2  ;;  %v1291_v4 = vrot.slane %v1283_v62, 3  ;;  %v2809_v5 = vpop.f32.mrb[25].mxu1 }
0x1731   :  { %v1286_v6 = vpop.f32.mrb[26].mxu1 }
0x1732   :  { %v1294_v7 = vadd.f32 %v1290_v1, %v3655_v22  ;;  %v1295_v8 = vadd.f32 %v1291_v4, %v3653_v20  ;;  %v2810_v9 = vpop.f32.mrb[27].mxu1 }
0x1734   :  { %3030 = vtanh.f32 %v1294_v7  ;;  %v2607_v12 = vmul.f32 -1.442695, %v1294_v7  ;;  %v2608_v13 = vmul.f32 -1.442695, %v1295_v8 }
0x1735   :  { %3032 = vtanh.f32 %v1295_v8 }
0x1736   :  { %3034 = vpow2.f32 %v2607_v12 }
0x1737   :  { %3036 = vpow2.f32 %v2608_v13 }
0x173e   :  { %v3031_v10 = vpop.eup %3030 }
0x173f   :  { %v3033_v11 = vpop.eup %3032  ;;  %1320 = vrot.lane.b32.xlu0 %v3031_v10, %s3380_s7 }
0x1740   :  { %1322 = vrot.lane.b32.xlu1 %v3033_v11, %s3380_s7  ;;  %v3035_v14 = vpop.eup %3034 }
0x1741   :  { %v3037_v15 = vpop.eup %3036  ;;  %v1302_v2 = vadd.f32 1.0, %v3035_v14 }
0x1742   :  { %v1303_v16 = vadd.f32 1.0, %v3037_v15 }
0x1743   :  { %3038 = vrcp.f32 %v1302_v2 }
0x1744   :  { %3040 = vrcp.f32 %v1303_v16  ;;  %v2920_v16 = vld [vmem:[%s4075_s8] sm:$0xff]  }
0x1745   :  { %2820 = vmatpush3.bf16.msra.mxu1 %v2920_v16 }
0x1746   :  { %2821 = vmatprep.subr.bf16.mxu1 %v3385_v0 }
0x174d   :  { %v3039_v3 = vpop.eup %3038 }
0x174e   :  { %v3041_v18 = vpop.eup %3040  ;;  %v1316_v24 = vmul.f32 %v3039_v3, %v1312_v23 }
0x174f   :  { %v1317_v25 = vmul.f32 %v3041_v18, %v1313_v61 }
0x17b1   :  { %v1321_v17 = vpop.permute.xlu0 %1320 }
0x17b2   :  { %v1323_v19 = vpop.permute.xlu1 %1322  ;;  %v1326_v21 = vmul.f32 %v3039_v3, %v1321_v17  ;;  %v2922_v17 = vld [vmem:[%s4075_s8 + $0x8] sm:$0xff]  }
0x17b3   :  { %v1327_v60 = vmul.f32 %v3041_v18, %v1323_v19  ;;  %2822 = vmatpush3.bf16.msra.mxu1 %v2922_v17 }
0x17b4   :  { %1330 = vrot.lane.b32.xlu0 %v1326_v21, %s3390_s6  ;;  %2835 = vmatprep.subr.bf16.mxu1 %v3385_v0 }
0x17b5   :  { %1332 = vrot.lane.b32.xlu1 %v1327_v60, %s3390_s6 }
0x1826   :  { %v1331_v26 = vpop.permute.xlu0 %1330 }
0x1827   :  { %v1333_v27 = vpop.permute.xlu1 %1332  ;;  %v1336_v28 = vadd.f32 %v1331_v26, %v1316_v24 }
0x1828   :  { %v1337_v29 = vadd.f32 %v1333_v27, %v1317_v25 }
0x1829   :  { %3042 = vtanh.f32 %v1336_v28  ;;  %v1428_v9 = vrot.slane %v1336_v28, 7 }
0x182a   :  { %3044 = vtanh.f32 %v1337_v29  ;;  %v1429_v10 = vrot.slane %v1337_v29, 7 }
0x1833   :  { %v3043_v30 = vpop.eup %3042 }
0x1834   :  { %v3045_v31 = vpop.eup %3044  ;;  %1342 = vrot.lane.b32.xlu0 %v3043_v30, %s3380_s7 }
0x1835   :  { %1344 = vrot.lane.b32.xlu1 %v3045_v31, %s3380_s7 }
0x18a6   :  { %v1343_v32 = vpop.permute.xlu0 %1342 }
0x18a7   :  { %v1345_v34 = vpop.permute.xlu1 %1344  ;;  %v1348_v36 = vmul.f32 %v3039_v3, %v1343_v32  ;;  %v3863_v3 = vld [vmem:[#allocation13] sm:$0xff]  }
0x18a8   :  { %v1349_v37 = vmul.f32 %v3041_v18, %v1345_v34  ;;  %v3869_v18 = vld [vmem:[#allocation13 + $0x8] sm:$0xff]   ;;  %v2612_v32 = vld [vmem:[%s4077_s10] ss:$0 sm:$0xff] }
0x18a9   :  { %v1350_v52 = vpack.c.bf16 %v1348_v36, %v1348_v36  ;;  %v3844_v48 = vsel %vm1480_vm10, %v3825_v49, %v1348_v36 }
0x18aa   :  { %v1351_v33 = vpack.c.bf16 %v1349_v37, %v1349_v37  ;;  %v3847_v35 = vsel %vm1480_vm10, %v3828_v51, %v1349_v37 }
0x18ab   :  { %v1354_v38 = vunpack.c.l.b16 %v1350_v52 }
0x18ac   :  { %v1355_v39 = vunpack.c.l.b16 %v1351_v33 }
0x18ad   :  { %v1356_v40 = vrot.slane %v1354_v38, 6 }
0x18ae   :  { %v1357_v41 = vrot.slane %v1355_v39, 5 }
0x18b0   :  { %v1358_v42 = vsel %vm663_vm4, %v1357_v41, %v1356_v40 }
0x18b1   :  { %v1359_v43 = vpack.c.b16 %v1358_v42, %v1358_v42 }
0x18b3   :  { %1360 = vrot.lane.b32.xlu0 %v1359_v43, %s3390_s6 }
0x1925   :  { %v1361_v44 = vpop.permute.xlu0 %1360 }
0x1926   :  { %2816 = vmatmul.mubr.msk.bf16.vlgmr.msra.gmra.mrb[28].mxu0 %vm558_vm5, %v1361_v44 }
0x1927   :  { %2831 = vmatprep.mubr.msk.bf16.mxu0 %vm3386_vm0, %v3385_v0  ;;  %2828 = vmatpush3.bf16.msra.mxu0 %v3863_v3 }
0x1928   :  { %2829 = vmatprep.subr.bf16.mxu0 %v3385_v0 }
0x192b   :  { %2830 = vmatpush3.bf16.msra.mxu0 %v3869_v18 }
0x192c   :  { %2843 = vmatprep.subr.bf16.mxu0 %v3385_v0 }
0x192e   :  { %2832 = vmatmul.mubr.bf16.vlgmr.msra.gmra.mrb[32].mxu0 %v3389_v63 }
0x192f   :  { %2844 = vmatpush3.bf16.msra.mxu0 %v3863_v3  ;;  %2847 = vmatprep.mubr.msk.bf16.mxu0 %vm3386_vm0, %v3385_v0 }
0x1930   :  { %2845 = vmatprep.subr.bf16.mxu0 %v3385_v0 }
0x1933   :  { %2846 = vmatpush3.bf16.msra.mxu0 %v3869_v18 }
0x1934   :  { %2859 = vmatprep.subr.bf16.mxu0 %v3385_v0 }
0x19f9   :  { %v1399_v45 = vpop.f32.mrb[28].mxu0 }
0x19fa   :  { %v1406_v46 = vrot.slane %v1399_v45, 1  ;;  %v1407_v47 = vrot.slane %v1399_v45, 2  ;;  %v2817_v49 = vpop.f32.mrb[29].mxu0 }
0x19fb   :  { %v1402_v50 = vpop.f32.mrb[30].mxu0 }
0x19fc   :  { %v1410_v51 = vadd.f32 %v1406_v46, %v3655_v22  ;;  %v1411_v53 = vadd.f32 %v1407_v47, %v3653_v20  ;;  %v2818_v54 = vpop.f32.mrb[31].mxu0 }
0x19fe   :  { %3046 = vtanh.f32 %v1410_v51  ;;  %v2610_v57 = vmul.f32 -1.442695, %v1410_v51  ;;  %v2611_v58 = vmul.f32 -1.442695, %v1411_v53 }
0x19ff   :  { %3048 = vtanh.f32 %v1411_v53 }
0x1a00   :  { %3050 = vpow2.f32 %v2610_v57 }
0x1a01   :  { %3052 = vpow2.f32 %v2611_v58  ;;  %v1607_v28 = vpop.f32.mrb[32].mxu0 }
0x1a02   :  { %v2833_v29 = vpop.f32.mrb[33].mxu0  ;;  %v1614_v37 = vrot.slane %v1607_v28, 1 }
0x1a03   :  { %v1610_v30 = vpop.f32.mrb[34].mxu0 }
0x1a04   :  { %v2834_v31 = vpop.f32.mrb[35].mxu0 }
0x1a08   :  { %v3047_v55 = vpop.eup %3046 }
0x1a09   :  { %v3049_v56 = vpop.eup %3048  ;;  %1436 = vrot.lane.b32.xlu1 %v3047_v55, %s3380_s7 }
0x1a0a   :  { %1438 = vrot.lane.b32.xlu0 %v3049_v56, %s3380_s7  ;;  %v3051_v59 = vpop.eup %3050 }
0x1a0b   :  { %v3053_v62 = vpop.eup %3052  ;;  %v1418_v1 = vadd.f32 1.0, %v3051_v59 }
0x1a0c   :  { %v1419_v4 = vadd.f32 1.0, %v3053_v62 }
0x1a0d   :  { %3054 = vrcp.f32 %v1418_v1 }
0x1a0e   :  { %3056 = vrcp.f32 %v1419_v4 }
0x1a17   :  { %v3055_v20 = vpop.eup %3054 }
0x1a18   :  { %v3057_v5 = vpop.eup %3056  ;;  %v1432_v11 = vmul.f32 %v3055_v20, %v1428_v9 }
0x1a19   :  { %v1433_v12 = vmul.f32 %v3057_v5, %v1429_v10 }
0x1a7b   :  { %v1437_v22 = vpop.permute.xlu1 %1436 }
0x1a7c   :  { %v1439_v6 = vpop.permute.xlu0 %1438  ;;  %v1442_v7 = vmul.f32 %v3055_v20, %v1437_v22 }
0x1a7d   :  { %v1443_v8 = vmul.f32 %v3057_v5, %v1439_v6 }
0x1a7e   :  { %1446 = vrot.lane.b32.xlu1 %v1442_v7, %s3390_s6 }
0x1a7f   :  { %1448 = vrot.lane.b32.xlu0 %v1443_v8, %s3390_s6 }
0x1af0   :  { %v1447_v13 = vpop.permute.xlu1 %1446 }
0x1af1   :  { %v1449_v14 = vpop.permute.xlu0 %1448  ;;  %v1452_v15 = vadd.f32 %v1447_v13, %v1432_v11 }
0x1af2   :  { %v1453_v2 = vadd.f32 %v1449_v14, %v1433_v12 }
0x1af3   :  { %3058 = vtanh.f32 %v1452_v15 }
0x1af4   :  { %3060 = vtanh.f32 %v1453_v2 }
0x1afd   :  { %v3059_v19 = vpop.eup %3058 }
0x1afe   :  { %v3061_v21 = vpop.eup %3060  ;;  %1458 = vrot.lane.b32.xlu1 %v3059_v19, %s3380_s7 }
0x1aff   :  { %1460 = vrot.lane.b32.xlu0 %v3061_v21, %s3380_s7 }
0x1b70   :  { %v1459_v60 = vpop.permute.xlu1 %1458 }
0x1b71   :  { %v1461_v23 = vpop.permute.xlu0 %1460  ;;  %v1464_v61 = vmul.f32 %v3055_v20, %v1459_v60 }
0x1b72   :  { %v1465_v24 = vmul.f32 %v3057_v5, %v1461_v23 }
0x1b73   :  { %v1484_v25 = vsel %vm1483_vm11, %v3844_v48, %v1464_v61 }
0x1b74   :  { %v1485_v63 = vsel %vm1483_vm11, %v3847_v35, %v1465_v24 }
0x1b75   :  { %v1495_v26 = vpack.c.bf16 %v1485_v63, %v1484_v25 }
0x1b77   :  { %1503 = vrot.lane.b32.xlu1 %v1495_v26, %s3390_s6 }
0x1be9   :  { %v1504_v27 = vpop.permute.xlu1 %1503 }
0x1bea   :  { %2824 = vmatmul.mubr.msk.bf16.vlgmr.msra.gmra.mrb[28].mxu1 %vm558_vm5, %v1504_v27 }
0x1beb   :  { %2836 = vmatpush3.bf16.msra.mxu1 %v3863_v3  ;;  %2839 = vmatprep.mubr.msk.bf16.mxu1 %vm3386_vm0, %v3385_v0 }
0x1bec   :  { %2837 = vmatprep.subr.bf16.mxu1 %v3385_v0 }
0x1bef   :  { %2838 = vmatpush3.bf16.msra.mxu1 %v3869_v18 }
0x1bf0   :  { %2851 = vmatprep.subr.bf16.mxu1 %v3385_v0 }
0x1cbd   :  { %v1554_v34 = vpop.f32.mrb[28].mxu1 }
0x1cbe   :  { %v3898_v36 = vadd.f32 %v2612_v32, %v1554_v34  ;;  %v2825_v52 = vpop.f32.mrb[29].mxu1 }
0x1cbf   :  { %v1557_v48 = vpop.f32.mrb[30].mxu1 }
0x1cc0   :  { %v1617_v33 = vadd.f32 %v1607_v28, %v3898_v36  ;;  %v3901_v35 = vadd.f32 %v2612_v32, %v1557_v48  ;;  %v2826_v38 = vpop.f32.mrb[31].mxu1 }
0x1cc2   :  { %3062 = vtanh.f32 %v1617_v33  ;;  %v1618_v39 = vadd.f32 %v1614_v37, %v3901_v35  ;;  %v2618_v42 = vmul.f32 -1.442695, %v1617_v33 }
0x1cc4   :  { %3064 = vtanh.f32 %v1618_v39  ;;  %v2619_v43 = vmul.f32 -1.442695, %v1618_v39 }
0x1cc5   :  { %3066 = vpow2.f32 %v2618_v42 }
0x1cc6   :  { %3068 = vpow2.f32 %v2619_v43 }
0x1ccc   :  { %v3063_v40 = vpop.eup %3062 }
0x1ccd   :  { %1637 = vrot.lane.b32.xlu1 %v3063_v40, %s3380_s7 }
0x1cce   :  { %v3065_v41 = vpop.eup %3064 }
0x1ccf   :  { %1639 = vrot.lane.b32.xlu0 %v3065_v41, %s3380_s7  ;;  %v3067_v44 = vpop.eup %3066 }
0x1cd0   :  { %v3069_v45 = vpop.eup %3068  ;;  %v1625_v46 = vadd.f32 1.0, %v3067_v44 }
0x1cd1   :  { %v1626_v47 = vadd.f32 1.0, %v3069_v45 }
0x1cd2   :  { %3070 = vrcp.f32 %v1625_v46 }
0x1cd3   :  { %3072 = vrcp.f32 %v1626_v47 }
0x1cdc   :  { %v3071_v49 = vpop.eup %3070 }
0x1cdd   :  { %v3073_v53 = vpop.eup %3072  ;;  %v1633_v56 = vmul.f32 0.0, %v3071_v49 }
0x1cde   :  { %v1634_v59 = vmul.f32 0.0, %v3073_v53 }
0x1d3f   :  { %v1638_v50 = vpop.permute.xlu1 %1637 }
0x1d40   :  { %v1643_v51 = vmul.f32 %v3071_v49, %v1638_v50 }
0x1d41   :  { %v1640_v54 = vpop.permute.xlu0 %1639 }
0x1d42   :  { %1647 = vrot.lane.b32.xlu1 %v1643_v51, %s3390_s6  ;;  %v1644_v55 = vmul.f32 %v3073_v53, %v1640_v54 }
0x1d44   :  { %1649 = vrot.lane.b32.xlu0 %v1644_v55, %s3390_s6 }
0x1db4   :  { %v1648_v57 = vpop.permute.xlu1 %1647 }
0x1db5   :  { %v3908_v58 = vadd.f32 %v1648_v57, %v1633_v56 }
0x1db6   :  { %v1650_v62 = vpop.permute.xlu0 %1649 }
0x1db7   :  { %3074 = vtanh.f32 %v3908_v58  ;;  %v1654_v1 = vadd.f32 %v1650_v62, %v1634_v59  ;;  %v1743_v38 = vrot.slane %v3908_v58, 7 }
0x1db9   :  { %3076 = vtanh.f32 %v1654_v1  ;;  %v1744_v48 = vrot.slane %v1654_v1, 7 }
0x1dc1   :  { %v3075_v4 = vpop.eup %3074 }
0x1dc2   :  { %1659 = vrot.lane.b32.xlu1 %v3075_v4, %s3380_s7 }
0x1dc3   :  { %v3077_v20 = vpop.eup %3076 }
0x1dc4   :  { %1661 = vrot.lane.b32.xlu0 %v3077_v20, %s3380_s7 }
0x1e34   :  { %v1660_v22 = vpop.permute.xlu1 %1659 }
0x1e35   :  { %v1665_v5 = vmul.f32 %v3071_v49, %v1660_v22 }
0x1e36   :  { %v1662_v6 = vpop.permute.xlu0 %1661 }
0x1e37   :  { %v1666_v7 = vmul.f32 %v3073_v53, %v1662_v6  ;;  %v1667_v8 = vpack.c.bf16 %v1665_v5, %v1665_v5 }
0x1e39   :  { %v1668_v9 = vpack.c.bf16 %v1666_v7, %v1666_v7  ;;  %v1671_v11 = vunpack.c.l.b16 %v1667_v8 }
0x1e3b   :  { %v1672_v10 = vunpack.c.l.b16 %v1668_v9 }
0x1e3d   :  { %v1673_v12 = vrot.slane %v1672_v10, 7 }
0x1e3f   :  { %v1674_v13 = vsel %vm663_vm4, %v1673_v12, %v1671_v11 }
0x1e40   :  { %v1675_v14 = vpack.c.b16 %v1674_v13, %v1674_v13 }
0x1e42   :  { %1676 = vrot.lane.b32.xlu0 %v1675_v14, %s3390_s6 }
0x1eb4   :  { %v1677_v15 = vpop.permute.xlu0 %1676 }
0x1eb5   :  { %2840 = vmatmul.mubr.msk.bf16.vlgmr.msra.gmra.mrb[32].mxu1 %vm558_vm5, %v1677_v15 }
0x1eb6   :  { %2852 = vmatpush3.bf16.msra.mxu1 %v3863_v3  ;;  %2855 = vmatprep.mubr.msk.bf16.mxu1 %vm3386_vm0, %v3385_v0 }
0x1eb7   :  { %2853 = vmatprep.subr.bf16.mxu1 %v3385_v0 }
0x1eba   :  { %2854 = vmatpush3.bf16.msra.mxu1 %v3869_v18 }
0x1ebb   :  { %2867 = vmatprep.subr.bf16.mxu1 %v3385_v0 }
0x1f88   :  { %v1715_v2 = vpop.f32.mrb[32].mxu1 }
0x1f89   :  { %v1722_v16 = vrot.slane %v1715_v2, 7  ;;  %v1726_v17 = vadd.f32 %v1715_v2, %v3901_v35  ;;  %v2841_v19 = vpop.f32.mrb[33].mxu1 }
0x1f8a   :  { %v1718_v21 = vpop.f32.mrb[34].mxu1 }
0x1f8b   :  { %v1725_v60 = vadd.f32 %v1722_v16, %v3898_v36  ;;  %3078 = vtanh.f32 %v1726_v17  ;;  %v2842_v23 = vpop.f32.mrb[35].mxu1  ;;  %v2622_v25 = vmul.f32 -1.442695, %v1726_v17 }
0x1f8d   :  { %3080 = vtanh.f32 %v1725_v60  ;;  %v2621_v63 = vmul.f32 -1.442695, %v1725_v60 }
0x1f8e   :  { %3082 = vpow2.f32 %v2622_v25 }
0x1f8f   :  { %3084 = vpow2.f32 %v2621_v63 }
0x1f95   :  { %v3079_v61 = vpop.eup %3078 }
0x1f96   :  { %1753 = vrot.lane.b32.xlu0 %v3079_v61, %s3380_s7 }
0x1f97   :  { %v3081_v24 = vpop.eup %3080 }
0x1f98   :  { %1751 = vrot.lane.b32.xlu1 %v3081_v24, %s3380_s7  ;;  %v3083_v26 = vpop.eup %3082 }
0x1f99   :  { %v3085_v27 = vpop.eup %3084  ;;  %v1734_v28 = vadd.f32 1.0, %v3083_v26 }
0x1f9a   :  { %v1733_v29 = vadd.f32 1.0, %v3085_v27 }
0x1f9b   :  { %3086 = vrcp.f32 %v1734_v28 }
0x1f9c   :  { %3088 = vrcp.f32 %v1733_v29 }
0x1fa5   :  { %v3087_v30 = vpop.eup %3086 }
0x1fa6   :  { %v3089_v34 = vpop.eup %3088  ;;  %v1748_v33 = vmul.f32 %v3087_v30, %v1744_v48 }
0x1fa7   :  { %v1747_v41 = vmul.f32 %v3089_v34, %v1743_v38 }
0x2008   :  { %v1754_v31 = vpop.permute.xlu0 %1753 }
0x2009   :  { %v1758_v32 = vmul.f32 %v3087_v30, %v1754_v31 }
0x200a   :  { %v1752_v37 = vpop.permute.xlu1 %1751 }
0x200b   :  { %1763 = vrot.lane.b32.xlu0 %v1758_v32, %s3390_s6  ;;  %v1757_v52 = vmul.f32 %v3089_v34, %v1752_v37 }
0x200d   :  { %1761 = vrot.lane.b32.xlu1 %v1757_v52, %s3390_s6 }
0x207d   :  { %v1764_v39 = vpop.permute.xlu0 %1763 }
0x207e   :  { %v3929_v40 = vadd.f32 %v1764_v39, %v1748_v33 }
0x207f   :  { %v1762_v42 = vpop.permute.xlu1 %1761 }
0x2080   :  { %3090 = vtanh.f32 %v3929_v40  ;;  %v1767_v43 = vadd.f32 %v1762_v42, %v1747_v41  ;;  %v1859_v61 = vrot.slane %v3929_v40, 7 }
0x2082   :  { %3092 = vtanh.f32 %v1767_v43  ;;  %v1858_v23 = vrot.slane %v1767_v43, 7 }
0x208a   :  { %v3091_v44 = vpop.eup %3090 }
0x208b   :  { %1775 = vrot.lane.b32.xlu0 %v3091_v44, %s3380_s7 }
0x208c   :  { %v3093_v45 = vpop.eup %3092 }
0x208d   :  { %1773 = vrot.lane.b32.xlu1 %v3093_v45, %s3380_s7 }
0x20fd   :  { %v1776_v46 = vpop.permute.xlu0 %1775 }
0x20fe   :  { %v1780_v47 = vmul.f32 %v3087_v30, %v1776_v46 }
0x20ff   :  { %v1774_v49 = vpop.permute.xlu1 %1773 }
0x2100   :  { %v1779_v50 = vmul.f32 %v3089_v34, %v1774_v49  ;;  %v1782_v51 = vpack.c.bf16 %v1780_v47, %v1780_v47 }
0x2102   :  { %v1781_v53 = vpack.c.bf16 %v1779_v50, %v1779_v50  ;;  %v1786_v55 = vunpack.c.l.b16 %v1782_v51 }
0x2104   :  { %v1785_v54 = vunpack.c.l.b16 %v1781_v53 }
0x2106   :  { %v1787_v56 = vrot.slane %v1785_v54, 1 }
0x2108   :  { %v1788_v57 = vsel %vm663_vm4, %v1786_v55, %v1787_v56 }
0x2109   :  { %v1789_v58 = vpack.c.b16 %v1788_v57, %v1788_v57 }
0x210b   :  { %1790 = vrot.lane.b32.xlu1 %v1789_v58, %s3390_s6 }
0x217d   :  { %v1791_v59 = vpop.permute.xlu1 %1790 }
0x217e   :  { %2848 = vmatmul.mubr.msk.bf16.vlgmr.msra.gmra.mrb[36].mxu0 %vm558_vm5, %v1791_v59 }
0x217f   :  { %2860 = vmatpush3.bf16.msra.mxu0 %v3863_v3  ;;  %2863 = vmatprep.mubr.msk.bf16.mxu0 %vm3386_vm0, %v3385_v0 }
0x2180   :  { %2861 = vmatprep.subr.bf16.mxu0 %v3385_v0 }
0x2183   :  { %2862 = vmatpush3.bf16.msra.mxu0 %v3869_v18 }
0x2184   :  { %2875 = vmatprep.subr.bf16.mxu0 %v3385_v0 }
0x2251   :  { %v1829_v62 = vpop.f32.mrb[36].mxu0 }
0x2252   :  { %v1836_v1 = vrot.slane %v1829_v62, 6  ;;  %v1837_v4 = vrot.slane %v1829_v62, 7  ;;  %v2849_v20 = vpop.f32.mrb[37].mxu0 }
0x2253   :  { %v1832_v22 = vpop.f32.mrb[38].mxu0 }
0x2254   :  { %v1840_v5 = vadd.f32 %v1836_v1, %v3898_v36  ;;  %v1841_v6 = vadd.f32 %v1837_v4, %v3901_v35  ;;  %v2850_v7 = vpop.f32.mrb[39].mxu0 }
0x2256   :  { %3094 = vtanh.f32 %v1840_v5  ;;  %v2624_v10 = vmul.f32 -1.442695, %v1840_v5  ;;  %v2625_v11 = vmul.f32 -1.442695, %v1841_v6 }
0x2257   :  { %3096 = vtanh.f32 %v1841_v6 }
0x2258   :  { %3098 = vpow2.f32 %v2624_v10 }
0x2259   :  { %3100 = vpow2.f32 %v2625_v11 }
0x2260   :  { %v3095_v8 = vpop.eup %3094 }
0x2261   :  { %v3097_v9 = vpop.eup %3096  ;;  %1866 = vrot.lane.b32.xlu0 %v3095_v8, %s3380_s7 }
0x2262   :  { %1868 = vrot.lane.b32.xlu1 %v3097_v9, %s3380_s7  ;;  %v3099_v12 = vpop.eup %3098 }
0x2263   :  { %v3101_v13 = vpop.eup %3100  ;;  %v1848_v14 = vadd.f32 1.0, %v3099_v12 }
0x2264   :  { %v1849_v15 = vadd.f32 1.0, %v3101_v13 }
0x2265   :  { %3102 = vrcp.f32 %v1848_v14 }
0x2266   :  { %3104 = vrcp.f32 %v1849_v15 }
0x226f   :  { %v3103_v2 = vpop.eup %3102 }
0x2270   :  { %v3105_v17 = vpop.eup %3104  ;;  %v1862_v24 = vmul.f32 %v3103_v2, %v1858_v23 }
0x2271   :  { %v1863_v25 = vmul.f32 %v3105_v17, %v1859_v61 }
0x22d3   :  { %v1867_v16 = vpop.permute.xlu0 %1866 }
0x22d4   :  { %v1869_v19 = vpop.permute.xlu1 %1868  ;;  %v1872_v21 = vmul.f32 %v3103_v2, %v1867_v16 }
0x22d5   :  { %v1873_v60 = vmul.f32 %v3105_v17, %v1869_v19 }
0x22d6   :  { %1876 = vrot.lane.b32.xlu0 %v1872_v21, %s3390_s6 }
0x22d7   :  { %1878 = vrot.lane.b32.xlu1 %v1873_v60, %s3390_s6 }
0x2348   :  { %v1877_v63 = vpop.permute.xlu0 %1876 }
0x2349   :  { %v1879_v26 = vpop.permute.xlu1 %1878  ;;  %v3950_v27 = vadd.f32 %v1877_v63, %v1862_v24 }
0x234a   :  { %v3952_v28 = vadd.f32 %v1879_v26, %v1863_v25 }
0x234b   :  { %3106 = vtanh.f32 %v3950_v27  ;;  %v1974_v8 = vrot.slane %v3950_v27, 7 }
0x234c   :  { %3108 = vtanh.f32 %v3952_v28  ;;  %v1975_v9 = vrot.slane %v3952_v28, 7 }
0x2355   :  { %v3107_v29 = vpop.eup %3106 }
0x2356   :  { %v3109_v30 = vpop.eup %3108  ;;  %1888 = vrot.lane.b32.xlu0 %v3107_v29, %s3380_s7 }
0x2357   :  { %1890 = vrot.lane.b32.xlu1 %v3109_v30, %s3380_s7 }
0x23c8   :  { %v1889_v31 = vpop.permute.xlu0 %1888 }
0x23c9   :  { %v1891_v32 = vpop.permute.xlu1 %1890  ;;  %v1894_v34 = vmul.f32 %v3103_v2, %v1889_v31 }
0x23ca   :  { %v1895_v37 = vmul.f32 %v3105_v17, %v1891_v32 }
0x23cb   :  { %v1896_v52 = vpack.c.bf16 %v1894_v34, %v1894_v34 }
0x23cc   :  { %v1897_v48 = vpack.c.bf16 %v1895_v37, %v1895_v37 }
0x23cd   :  { %v1900_v33 = vunpack.c.l.b16 %v1896_v52 }
0x23ce   :  { %v1901_v38 = vunpack.c.l.b16 %v1897_v48 }
0x23cf   :  { %v1902_v39 = vrot.slane %v1900_v33, 2 }
0x23d0   :  { %v1903_v40 = vrot.slane %v1901_v38, 1 }
0x23d2   :  { %v1904_v41 = vsel %vm663_vm4, %v1903_v40, %v1902_v39 }
0x23d3   :  { %v1905_v42 = vpack.c.b16 %v1904_v41, %v1904_v41 }
0x23d5   :  { %1906 = vrot.lane.b32.xlu0 %v1905_v42, %s3390_s6 }
0x2447   :  { %v1907_v43 = vpop.permute.xlu0 %1906 }
0x2448   :  { %2856 = vmatmul.mubr.msk.bf16.vlgmr.msra.gmra.mrb[36].mxu1 %vm558_vm5, %v1907_v43 }
0x2449   :  { %2868 = vmatpush3.bf16.msra.mxu1 %v3863_v3  ;;  %2871 = vmatprep.mubr.msk.bf16.mxu1 %vm3386_vm0, %v3385_v0 }
0x244a   :  { %2869 = vmatprep.subr.bf16.mxu1 %v3385_v0 }
0x244d   :  { %2870 = vmatpush3.bf16.msra.mxu1 %v3869_v18 }
0x244e   :  { %2883 = vmatprep.subr.bf16.mxu1 %v3385_v0 }
0x251b   :  { %v1945_v44 = vpop.f32.mrb[36].mxu1 }
0x251c   :  { %v1952_v45 = vrot.slane %v1945_v44, 5  ;;  %v1953_v46 = vrot.slane %v1945_v44, 6  ;;  %v2857_v47 = vpop.f32.mrb[37].mxu1 }
0x251d   :  { %v1948_v49 = vpop.f32.mrb[38].mxu1 }
0x251e   :  { %v1956_v50 = vadd.f32 %v1952_v45, %v3898_v36  ;;  %v1957_v51 = vadd.f32 %v1953_v46, %v3901_v35  ;;  %v2858_v53 = vpop.f32.mrb[39].mxu1 }
0x2520   :  { %3110 = vtanh.f32 %v1956_v50  ;;  %v2627_v56 = vmul.f32 -1.442695, %v1956_v50  ;;  %v2628_v57 = vmul.f32 -1.442695, %v1957_v51 }
0x2521   :  { %3112 = vtanh.f32 %v1957_v51 }
0x2522   :  { %3114 = vpow2.f32 %v2627_v56 }
0x2523   :  { %3116 = vpow2.f32 %v2628_v57 }
0x252a   :  { %v3111_v54 = vpop.eup %3110 }
0x252b   :  { %v3113_v55 = vpop.eup %3112  ;;  %1982 = vrot.lane.b32.xlu1 %v3111_v54, %s3380_s7 }
0x252c   :  { %1984 = vrot.lane.b32.xlu0 %v3113_v55, %s3380_s7  ;;  %v3115_v58 = vpop.eup %3114 }
0x252d   :  { %v3117_v59 = vpop.eup %3116  ;;  %v1964_v62 = vadd.f32 1.0, %v3115_v58 }
0x252e   :  { %v1965_v1 = vadd.f32 1.0, %v3117_v59 }
0x252f   :  { %3118 = vrcp.f32 %v1964_v62 }
0x2530   :  { %3120 = vrcp.f32 %v1965_v1 }
0x2539   :  { %v3119_v4 = vpop.eup %3118 }
0x253a   :  { %v3121_v22 = vpop.eup %3120  ;;  %v1978_v10 = vmul.f32 %v3119_v4, %v1974_v8 }
0x253b   :  { %v1979_v11 = vmul.f32 %v3121_v22, %v1975_v9 }
0x259d   :  { %v1983_v20 = vpop.permute.xlu1 %1982 }
0x259e   :  { %v1985_v5 = vpop.permute.xlu0 %1984  ;;  %v1988_v6 = vmul.f32 %v3119_v4, %v1983_v20 }
0x259f   :  { %v1989_v7 = vmul.f32 %v3121_v22, %v1985_v5 }
0x25a0   :  { %1992 = vrot.lane.b32.xlu1 %v1988_v6, %s3390_s6 }
0x25a1   :  { %1994 = vrot.lane.b32.xlu0 %v1989_v7, %s3390_s6 }
0x2612   :  { %v1993_v12 = vpop.permute.xlu1 %1992 }
0x2613   :  { %v1995_v13 = vpop.permute.xlu0 %1994  ;;  %v3975_v14 = vadd.f32 %v1993_v12, %v1978_v10 }
0x2614   :  { %v3977_v15 = vadd.f32 %v1995_v13, %v1979_v11 }
0x2615   :  { %3122 = vtanh.f32 %v3975_v14  ;;  %v2090_v54 = vrot.slane %v3975_v14, 7 }
0x2616   :  { %3124 = vtanh.f32 %v3977_v15  ;;  %v2091_v55 = vrot.slane %v3977_v15, 7 }
0x261f   :  { %v3123_v2 = vpop.eup %3122 }
0x2620   :  { %v3125_v16 = vpop.eup %3124  ;;  %2004 = vrot.lane.b32.xlu1 %v3123_v2, %s3380_s7 }
0x2621   :  { %2006 = vrot.lane.b32.xlu0 %v3125_v16, %s3380_s7 }
0x2692   :  { %v2005_v17 = vpop.permute.xlu1 %2004 }
0x2693   :  { %v2007_v19 = vpop.permute.xlu0 %2006  ;;  %v2010_v21 = vmul.f32 %v3119_v4, %v2005_v17 }
0x2694   :  { %v2011_v60 = vmul.f32 %v3121_v22, %v2007_v19 }
0x2695   :  { %v2012_v23 = vpack.c.bf16 %v2010_v21, %v2010_v21 }
0x2696   :  { %v2013_v61 = vpack.c.bf16 %v2011_v60, %v2011_v60 }
0x2697   :  { %v2016_v24 = vunpack.c.l.b16 %v2012_v23 }
0x2698   :  { %v2017_v25 = vunpack.c.l.b16 %v2013_v61 }
0x2699   :  { %v2018_v63 = vrot.slane %v2016_v24, 3 }
0x269a   :  { %v2019_v26 = vrot.slane %v2017_v25, 2 }
0x269c   :  { %v2020_v27 = vsel %vm663_vm4, %v2019_v26, %v2018_v63 }
0x269d   :  { %v2021_v28 = vpack.c.b16 %v2020_v27, %v2020_v27 }
0x269f   :  { %2022 = vrot.lane.b32.xlu1 %v2021_v28, %s3390_s6 }
0x2711   :  { %v2023_v29 = vpop.permute.xlu1 %2022 }
0x2712   :  { %2864 = vmatmul.mubr.msk.bf16.vlgmr.msra.gmra.mrb[40].mxu0 %vm558_vm5, %v2023_v29 }
0x2713   :  { %2876 = vmatpush3.bf16.msra.mxu0 %v3863_v3  ;;  %2879 = vmatprep.mubr.msk.bf16.mxu0 %vm3386_vm0, %v3385_v0 }
0x2714   :  { %2877 = vmatprep.subr.bf16.mxu0 %v3385_v0 }
0x2717   :  { %2878 = vmatpush3.bf16.msra.mxu0 %v3869_v18 }
0x2718   :  { %2891 = vmatprep.subr.bf16.mxu0 %v3385_v0 }
0x27e5   :  { %v2061_v30 = vpop.f32.mrb[40].mxu0 }
0x27e6   :  { %v2068_v31 = vrot.slane %v2061_v30, 4  ;;  %v2069_v32 = vrot.slane %v2061_v30, 5  ;;  %v2865_v34 = vpop.f32.mrb[41].mxu0 }
0x27e7   :  { %v2064_v37 = vpop.f32.mrb[42].mxu0 }
0x27e8   :  { %v2072_v52 = vadd.f32 %v2068_v31, %v3898_v36  ;;  %v2073_v48 = vadd.f32 %v2069_v32, %v3901_v35  ;;  %v2866_v33 = vpop.f32.mrb[43].mxu0 }
0x27ea   :  { %3126 = vtanh.f32 %v2072_v52  ;;  %v2630_v40 = vmul.f32 -1.442695, %v2072_v52  ;;  %v2631_v41 = vmul.f32 -1.442695, %v2073_v48 }
0x27eb   :  { %3128 = vtanh.f32 %v2073_v48 }
0x27ec   :  { %3130 = vpow2.f32 %v2630_v40 }
0x27ed   :  { %3132 = vpow2.f32 %v2631_v41 }
0x27f4   :  { %v3127_v38 = vpop.eup %3126 }
0x27f5   :  { %v3129_v39 = vpop.eup %3128  ;;  %2098 = vrot.lane.b32.xlu0 %v3127_v38, %s3380_s7 }
0x27f6   :  { %2100 = vrot.lane.b32.xlu1 %v3129_v39, %s3380_s7  ;;  %v3131_v42 = vpop.eup %3130 }
0x27f7   :  { %v3133_v43 = vpop.eup %3132  ;;  %v2080_v44 = vadd.f32 1.0, %v3131_v42 }
0x27f8   :  { %v2081_v45 = vadd.f32 1.0, %v3133_v43 }
0x27f9   :  { %3134 = vrcp.f32 %v2080_v44 }
0x27fa   :  { %3136 = vrcp.f32 %v2081_v45 }
0x2803   :  { %v3135_v46 = vpop.eup %3134 }
0x2804   :  { %v3137_v49 = vpop.eup %3136  ;;  %v2094_v56 = vmul.f32 %v3135_v46, %v2090_v54 }
0x2805   :  { %v2095_v57 = vmul.f32 %v3137_v49, %v2091_v55 }
0x2867   :  { %v2099_v47 = vpop.permute.xlu0 %2098 }
0x2868   :  { %v2101_v50 = vpop.permute.xlu1 %2100  ;;  %v2104_v51 = vmul.f32 %v3135_v46, %v2099_v47 }
0x2869   :  { %v2105_v53 = vmul.f32 %v3137_v49, %v2101_v50 }
0x286a   :  { %2108 = vrot.lane.b32.xlu0 %v2104_v51, %s3390_s6 }
0x286b   :  { %2110 = vrot.lane.b32.xlu1 %v2105_v53, %s3390_s6 }
0x28dc   :  { %v2109_v58 = vpop.permute.xlu0 %2108 }
0x28dd   :  { %v2111_v59 = vpop.permute.xlu1 %2110  ;;  %v2114_v62 = vadd.f32 %v2109_v58, %v2094_v56 }
0x28de   :  { %v2115_v1 = vadd.f32 %v2111_v59, %v2095_v57 }
0x28df   :  { %3138 = vtanh.f32 %v2114_v62  ;;  %v2206_v48 = vrot.slane %v2114_v62, 7 }
0x28e0   :  { %3140 = vtanh.f32 %v2115_v1  ;;  %v2207_v33 = vrot.slane %v2115_v1, 7 }
0x28e9   :  { %v3139_v4 = vpop.eup %3138 }
0x28ea   :  { %v3141_v20 = vpop.eup %3140  ;;  %2120 = vrot.lane.b32.xlu0 %v3139_v4, %s3380_s7 }
0x28eb   :  { %2122 = vrot.lane.b32.xlu1 %v3141_v20, %s3380_s7 }
0x295c   :  { %v2121_v22 = vpop.permute.xlu0 %2120 }
0x295d   :  { %v2123_v5 = vpop.permute.xlu1 %2122  ;;  %v2126_v6 = vmul.f32 %v3135_v46, %v2121_v22 }
0x295e   :  { %v2127_v7 = vmul.f32 %v3137_v49, %v2123_v5 }
0x295f   :  { %v2128_v8 = vpack.c.bf16 %v2126_v6, %v2126_v6 }
0x2960   :  { %v2129_v9 = vpack.c.bf16 %v2127_v7, %v2127_v7 }
0x2961   :  { %v2132_v10 = vunpack.c.l.b16 %v2128_v8 }
0x2962   :  { %v2133_v11 = vunpack.c.l.b16 %v2129_v9 }
0x2963   :  { %v2134_v12 = vrot.slane %v2132_v10, 4 }
0x2964   :  { %v2135_v13 = vrot.slane %v2133_v11, 3 }
0x2966   :  { %v2136_v14 = vsel %vm663_vm4, %v2135_v13, %v2134_v12 }
0x2967   :  { %v2137_v15 = vpack.c.b16 %v2136_v14, %v2136_v14 }
0x2969   :  { %2138 = vrot.lane.b32.xlu0 %v2137_v15, %s3390_s6 }
0x29db   :  { %v2139_v2 = vpop.permute.xlu0 %2138 }
0x29dc   :  { %2872 = vmatmul.mubr.msk.bf16.vlgmr.msra.gmra.mrb[40].mxu1 %vm558_vm5, %v2139_v2 }
0x29dd   :  { %2884 = vmatpush3.bf16.msra.mxu1 %v3863_v3  ;;  %2887 = vmatprep.mubr.msk.bf16.mxu1 %vm3386_vm0, %v3385_v0 }
0x29de   :  { %2885 = vmatprep.subr.bf16.mxu1 %v3385_v0 }
0x29e1   :  { %2886 = vmatpush3.bf16.msra.mxu1 %v3869_v18 }
0x2aaf   :  { %v2177_v16 = vpop.f32.mrb[40].mxu1 }
0x2ab0   :  { %v2184_v17 = vrot.slane %v2177_v16, 3  ;;  %v2185_v19 = vrot.slane %v2177_v16, 4  ;;  %v2873_v21 = vpop.f32.mrb[41].mxu1 }
0x2ab1   :  { %v2180_v60 = vpop.f32.mrb[42].mxu1 }
0x2ab2   :  { %v2188_v23 = vadd.f32 %v2184_v17, %v3898_v36  ;;  %v2189_v61 = vadd.f32 %v2185_v19, %v3901_v35  ;;  %v2874_v24 = vpop.f32.mrb[43].mxu1 }
0x2ab4   :  { %3142 = vtanh.f32 %v2188_v23  ;;  %v2633_v63 = vmul.f32 -1.442695, %v2188_v23  ;;  %v2634_v18 = vmul.f32 -1.442695, %v2189_v61 }
0x2ab5   :  { %3144 = vtanh.f32 %v2189_v61 }
0x2ab6   :  { %3146 = vpow2.f32 %v2633_v63 }
0x2ab7   :  { %3148 = vpow2.f32 %v2634_v18 }
0x2abe   :  { %v3143_v3 = vpop.eup %3142 }
0x2abf   :  { %v3145_v25 = vpop.eup %3144  ;;  %2214 = vrot.lane.b32.xlu1 %v3143_v3, %s3380_s7 }
0x2ac0   :  { %2216 = vrot.lane.b32.xlu0 %v3145_v25, %s3380_s7  ;;  %v3147_v26 = vpop.eup %3146 }
0x2ac1   :  { %v3149_v27 = vpop.eup %3148  ;;  %v2196_v28 = vadd.f32 1.0, %v3147_v26 }
0x2ac2   :  { %v2197_v29 = vadd.f32 1.0, %v3149_v27 }
0x2ac3   :  { %3150 = vrcp.f32 %v2196_v28 }
0x2ac4   :  { %3152 = vrcp.f32 %v2197_v29 }
0x2acd   :  { %v3151_v30 = vpop.eup %3150 }
0x2ace   :  { %v3153_v32 = vpop.eup %3152  ;;  %v2210_v38 = vmul.f32 %v3151_v30, %v2206_v48 }
0x2acf   :  { %v2211_v39 = vmul.f32 %v3153_v32, %v2207_v33 }
0x2b31   :  { %v2215_v31 = vpop.permute.xlu1 %2214 }
0x2b32   :  { %v2217_v34 = vpop.permute.xlu0 %2216  ;;  %v2220_v37 = vmul.f32 %v3151_v30, %v2215_v31 }
0x2b33   :  { %v2221_v52 = vmul.f32 %v3153_v32, %v2217_v34 }
0x2b34   :  { %2224 = vrot.lane.b32.xlu1 %v2220_v37, %s3390_s6 }
0x2b35   :  { %2226 = vrot.lane.b32.xlu0 %v2221_v52, %s3390_s6 }
0x2ba6   :  { %v2225_v40 = vpop.permute.xlu1 %2224 }
0x2ba7   :  { %v2227_v41 = vpop.permute.xlu0 %2226  ;;  %v2230_v42 = vadd.f32 %v2225_v40, %v2210_v38 }
0x2ba8   :  { %v2231_v43 = vadd.f32 %v2227_v41, %v2211_v39 }
0x2ba9   :  { %3154 = vtanh.f32 %v2230_v42  ;;  %v2322_v61 = vrot.slane %v2230_v42, 7 }
0x2baa   :  { %3156 = vtanh.f32 %v2231_v43  ;;  %v2323_v24 = vrot.slane %v2231_v43, 7 }
0x2bb3   :  { %v3155_v44 = vpop.eup %3154 }
0x2bb4   :  { %v3157_v45 = vpop.eup %3156  ;;  %2236 = vrot.lane.b32.xlu1 %v3155_v44, %s3380_s7 }
0x2bb5   :  { %2238 = vrot.lane.b32.xlu0 %v3157_v45, %s3380_s7 }
0x2c26   :  { %v2237_v46 = vpop.permute.xlu1 %2236 }
0x2c27   :  { %v2239_v47 = vpop.permute.xlu0 %2238  ;;  %v2242_v49 = vmul.f32 %v3151_v30, %v2237_v46 }
0x2c28   :  { %v2243_v50 = vmul.f32 %v3153_v32, %v2239_v47 }
0x2c29   :  { %v2244_v51 = vpack.c.bf16 %v2242_v49, %v2242_v49 }
0x2c2a   :  { %v2245_v53 = vpack.c.bf16 %v2243_v50, %v2243_v50 }
0x2c2b   :  { %v2248_v54 = vunpack.c.l.b16 %v2244_v51 }
0x2c2c   :  { %v2249_v55 = vunpack.c.l.b16 %v2245_v53 }
0x2c2d   :  { %v2250_v56 = vrot.slane %v2248_v54, 5 }
0x2c2e   :  { %v2251_v57 = vrot.slane %v2249_v55, 4 }
0x2c30   :  { %v2252_v58 = vsel %vm663_vm4, %v2251_v57, %v2250_v56 }
0x2c31   :  { %v2253_v59 = vpack.c.b16 %v2252_v58, %v2252_v58 }
0x2c33   :  { %2254 = vrot.lane.b32.xlu1 %v2253_v59, %s3390_s6 }
0x2ca5   :  { %v2255_v62 = vpop.permute.xlu1 %2254 }
0x2ca6   :  { %2880 = vmatmul.mubr.msk.bf16.vlgmr.msra.gmra.mrb[44].mxu0 %vm558_vm5, %v2255_v62 }
0x2ca7   :  { %2895 = vmatprep.mubr.msk.bf16.mxu0 %vm3386_vm0, %v3385_v0 }
0x2d79   :  { %v2293_v1 = vpop.f32.mrb[44].mxu0 }
0x2d7a   :  { %v2300_v4 = vrot.slane %v2293_v1, 2  ;;  %v2301_v20 = vrot.slane %v2293_v1, 3  ;;  %v2881_v22 = vpop.f32.mrb[45].mxu0 }
0x2d7b   :  { %v2296_v5 = vpop.f32.mrb[46].mxu0 }
0x2d7c   :  { %v2304_v6 = vadd.f32 %v2300_v4, %v3898_v36  ;;  %v2305_v7 = vadd.f32 %v2301_v20, %v3901_v35  ;;  %v2882_v8 = vpop.f32.mrb[47].mxu0 }
0x2d7e   :  { %3158 = vtanh.f32 %v2304_v6  ;;  %v2636_v11 = vmul.f32 -1.442695, %v2304_v6  ;;  %v2637_v12 = vmul.f32 -1.442695, %v2305_v7 }
0x2d7f   :  { %3160 = vtanh.f32 %v2305_v7 }
0x2d80   :  { %3162 = vpow2.f32 %v2636_v11 }
0x2d81   :  { %3164 = vpow2.f32 %v2637_v12 }
0x2d88   :  { %v3159_v9 = vpop.eup %3158 }
0x2d89   :  { %v3161_v10 = vpop.eup %3160  ;;  %2330 = vrot.lane.b32.xlu0 %v3159_v9, %s3380_s7 }
0x2d8a   :  { %2332 = vrot.lane.b32.xlu1 %v3161_v10, %s3380_s7  ;;  %v3163_v13 = vpop.eup %3162 }
0x2d8b   :  { %v3165_v14 = vpop.eup %3164  ;;  %v2312_v15 = vadd.f32 1.0, %v3163_v13 }
0x2d8c   :  { %v2313_v2 = vadd.f32 1.0, %v3165_v14  ;;  %v2924_v14 = vld [vmem:[%s4078_s11] sm:$0xff]  }
0x2d8d   :  { %3166 = vrcp.f32 %v2312_v15  ;;  %2892 = vmatpush3.bf16.msra.mxu0 %v2924_v14 }
0x2d8e   :  { %3168 = vrcp.f32 %v2313_v2  ;;  %v2925_v2 = vld [vmem:[%s4078_s11 + $0x8] sm:$0xff]   ;;  %2893 = vmatprep.subr.bf16.mxu0 %v3385_v0  ;;  %v2641_v0 = vld [vmem:[%s4079_s12] ss:$0 sm:$0xff] }
0x2d91   :  { %2894 = vmatpush3.bf16.msra.mxu0 %v2925_v2 }
0x2d97   :  { %v3167_v16 = vpop.eup %3166 }
0x2d98   :  { %v3169_v19 = vpop.eup %3168  ;;  %v2326_v3 = vmul.f32 %v3167_v16, %v2322_v61 }
0x2d99   :  { %v2327_v25 = vmul.f32 %v3169_v19, %v2323_v24 }
0x2dfb   :  { %v2331_v17 = vpop.permute.xlu0 %2330 }
0x2dfc   :  { %v2333_v21 = vpop.permute.xlu1 %2332  ;;  %v2336_v60 = vmul.f32 %v3167_v16, %v2331_v17 }
0x2dfd   :  { %v2337_v23 = vmul.f32 %v3169_v19, %v2333_v21 }
0x2dfe   :  { %2340 = vrot.lane.b32.xlu0 %v2336_v60, %s3390_s6 }
0x2dff   :  { %2342 = vrot.lane.b32.xlu1 %v2337_v23, %s3390_s6 }
0x2e70   :  { %v2341_v63 = vpop.permute.xlu0 %2340 }
0x2e71   :  { %v2343_v18 = vpop.permute.xlu1 %2342  ;;  %v2346_v26 = vadd.f32 %v2341_v63, %v2326_v3 }
0x2e72   :  { %v2347_v27 = vadd.f32 %v2343_v18, %v2327_v25 }
0x2e73   :  { %3170 = vtanh.f32 %v2346_v26  ;;  %v2438_v5 = vrot.slane %v2346_v26, 7 }
0x2e74   :  { %3172 = vtanh.f32 %v2347_v27  ;;  %v2439_v6 = vrot.slane %v2347_v27, 7 }
0x2e7d   :  { %v3171_v28 = vpop.eup %3170 }
0x2e7e   :  { %v3173_v29 = vpop.eup %3172  ;;  %2352 = vrot.lane.b32.xlu0 %v3171_v28, %s3380_s7 }
0x2e7f   :  { %2354 = vrot.lane.b32.xlu1 %v3173_v29, %s3380_s7 }
0x2ef0   :  { %v2353_v30 = vpop.permute.xlu0 %2352 }
0x2ef1   :  { %v2355_v31 = vpop.permute.xlu1 %2354  ;;  %v2358_v32 = vmul.f32 %v3167_v16, %v2353_v30 }
0x2ef2   :  { %v2359_v34 = vmul.f32 %v3169_v19, %v2355_v31 }
0x2ef3   :  { %v2360_v37 = vpack.c.bf16 %v2358_v32, %v2358_v32 }
0x2ef4   :  { %v2361_v52 = vpack.c.bf16 %v2359_v34, %v2359_v34 }
0x2ef5   :  { %v2364_v48 = vunpack.c.l.b16 %v2360_v37 }
0x2ef6   :  { %v2365_v33 = vunpack.c.l.b16 %v2361_v52 }
0x2ef7   :  { %v2366_v38 = vrot.slane %v2364_v48, 6 }
0x2ef8   :  { %v2367_v39 = vrot.slane %v2365_v33, 5 }
0x2efa   :  { %v2368_v40 = vsel %vm663_vm4, %v2367_v39, %v2366_v38 }
0x2efb   :  { %v2369_v41 = vpack.c.b16 %v2368_v40, %v2368_v40 }
0x2efd   :  { %2370 = vrot.lane.b32.xlu0 %v2369_v41, %s3390_s6 }
0x2f6f   :  { %v2371_v42 = vpop.permute.xlu0 %2370 }
0x2f70   :  { %2888 = vmatmul.mubr.msk.bf16.vlgmr.msra.gmra.mrb[44].mxu1 %vm558_vm5, %v2371_v42 }
0x3043   :  { %v2409_v43 = vpop.f32.mrb[44].mxu1 }
0x3044   :  { %v2416_v44 = vrot.slane %v2409_v43, 1  ;;  %v2417_v45 = vrot.slane %v2409_v43, 2  ;;  %v2889_v46 = vpop.f32.mrb[45].mxu1 }
0x3045   :  { %v2412_v47 = vpop.f32.mrb[46].mxu1 }
0x3046   :  { %v2420_v49 = vadd.f32 %v2416_v44, %v3898_v36  ;;  %v2421_v50 = vadd.f32 %v2417_v45, %v3901_v35  ;;  %v2890_v51 = vpop.f32.mrb[47].mxu1 }
0x3048   :  { %3174 = vtanh.f32 %v2420_v49  ;;  %v2639_v55 = vmul.f32 -1.442695, %v2420_v49  ;;  %v2640_v56 = vmul.f32 -1.442695, %v2421_v50 }
0x3049   :  { %3176 = vtanh.f32 %v2421_v50 }
0x304a   :  { %3178 = vpow2.f32 %v2639_v55 }
0x304b   :  { %3180 = vpow2.f32 %v2640_v56 }
0x3052   :  { %v3175_v53 = vpop.eup %3174 }
0x3053   :  { %v3177_v54 = vpop.eup %3176  ;;  %2446 = vrot.lane.b32.xlu1 %v3175_v53, %s3380_s7 }
0x3054   :  { %2448 = vrot.lane.b32.xlu0 %v3177_v54, %s3380_s7  ;;  %v3179_v57 = vpop.eup %3178 }
0x3055   :  { %v3181_v58 = vpop.eup %3180  ;;  %v2428_v59 = vadd.f32 1.0, %v3179_v57 }
0x3056   :  { %v2429_v62 = vadd.f32 1.0, %v3181_v58 }
0x3057   :  { %3182 = vrcp.f32 %v2428_v59 }
0x3058   :  { %3184 = vrcp.f32 %v2429_v62 }
0x3061   :  { %v3183_v36 = vpop.eup %3182 }
0x3062   :  { %v3185_v1 = vpop.eup %3184  ;;  %v2442_v7 = vmul.f32 %v3183_v36, %v2438_v5 }
0x3063   :  { %v2443_v8 = vmul.f32 %v3185_v1, %v2439_v6 }
0x30c5   :  { %v2447_v35 = vpop.permute.xlu1 %2446 }
0x30c6   :  { %v2449_v4 = vpop.permute.xlu0 %2448  ;;  %v2452_v20 = vmul.f32 %v3183_v36, %v2447_v35 }
0x30c7   :  { %v2453_v22 = vmul.f32 %v3185_v1, %v2449_v4 }
0x30c8   :  { %2456 = vrot.lane.b32.xlu1 %v2452_v20, %s3390_s6 }
0x30c9   :  { %2458 = vrot.lane.b32.xlu0 %v2453_v22, %s3390_s6 }
0x313a   :  { %v2457_v9 = vpop.permute.xlu1 %2456 }
0x313b   :  { %v2459_v10 = vpop.permute.xlu0 %2458  ;;  %v2462_v11 = vadd.f32 %v2457_v9, %v2442_v7 }
0x313c   :  { %v2463_v12 = vadd.f32 %v2459_v10, %v2443_v8 }
0x313d   :  { %3186 = vtanh.f32 %v2462_v11 }
0x313e   :  { %3188 = vtanh.f32 %v2463_v12 }
0x3147   :  { %v3187_v13 = vpop.eup %3186 }
0x3148   :  { %v3189_v15 = vpop.eup %3188  ;;  %2468 = vrot.lane.b32.xlu1 %v3187_v13, %s3380_s7 }
0x3149   :  { %2470 = vrot.lane.b32.xlu0 %v3189_v15, %s3380_s7 }
0x31ba   :  { %v2469_v16 = vpop.permute.xlu1 %2468 }
0x31bb   :  { %v2471_v17 = vpop.permute.xlu0 %2470  ;;  %v2474_v19 = vmul.f32 %v3183_v36, %v2469_v16 }
0x31bc   :  { %v2475_v21 = vmul.f32 %v3185_v1, %v2471_v17 }
0x31bd   :  { %v2476_v60 = vpack.c.bf16 %v2474_v19, %v2474_v19 }
0x31be   :  { %v2477_v23 = vpack.c.bf16 %v2475_v21, %v2475_v21 }
0x31bf   :  { %v2491_v61 = vunpack.c.l.b16 %v2476_v60 }
0x31c0   :  { %v2492_v24 = vunpack.c.l.b16 %v2477_v23 }
0x31c1   :  { %v2493_v3 = vrot.slane %v2491_v61, 7 }
0x31c2   :  { %v2494_v25 = vrot.slane %v2492_v24, 6 }
0x31c4   :  { %v2495_v63 = vsel %vm663_vm4, %v2494_v25, %v2493_v3 }
0x31c5   :  { %v2496_v18 = vpack.c.b16 %v2495_v63, %v2495_v63 }
0x31c7   :  { %2497 = vrot.lane.b32.xlu1 %v2496_v18, %s3390_s6 }
0x3239   :  { %v2498_v26 = vpop.permute.xlu1 %2497 }
0x323a   :  { %2896 = vmatmul.mubr.msk.bf16.vlgmr.msra.gmra.mrb[48].mxu0 %vm558_vm5, %v2498_v26 }
0x330d   :  { %v2548_v27 = vpop.f32.mrb[48].mxu0 }
0x330e   :  { %v2549_v28 = vadd.f32 %v2641_v0, %v2548_v27  ;;  %v2897_v29 = vpop.f32.mrb[49].mxu0 }
0x330f   :  { %v2551_v30 = vpop.f32.mrb[50].mxu0 }
0x3310   :  { %v2898_v31 = vpop.f32.mrb[51].mxu0  ;;  %2555 = vst.msk [vmem:[#allocation14] sm:$0x3] %vm2554_vm12, %v2549_v28 }
0x3311   :  { %3355 = shalt.err (!%p3352_p4)
}
0x3312   :  { %s3356_s12 = scalar_lea.hbm %s4080_s13, 32 }
0x3313   :  { %p3357_p5 = scmp.ne.s32.totalorder %s4080_s13, %s3356_s12  ;;  %p3360_p6 = scmp.lt.u32.totalorder %s3356_s12, %s4080_s13 }
0x3315   :  { %p3362_p7 = pnand %p3360_p6, %p3357_p5 }
0x3317   :  { %3365 = shalt.err (!%p3362_p7)
}
0x3318   :  { %2565 = dma.vmem_to_hbm [thread:$0]  %s2563_s20, 32, %s4080_s13, [#allocation4]  }
0x3319   :  { %3374 = dma.done.wait [#allocation4], 32  }
0x331a   :  { %3375 = vsyncadd [#allocation4], 4294967264 }
0x331b   :  { %2569 = vsyncpa [#allocation3], 1 }
0x331c   :  { %2570 = vsyncpa [#allocation6], 1 }
0x331d   :  { %2571 = vsyncpa [#allocation9], 1 }
0x331e   :  { %2572 = vsyncpa [#allocation12], 1 }
0x331f   :  { %2573 = vsyncpa [#allocation4], 1 }

</bundles_post_ra>
